<compile_context>
chip_gen: v7x
topology: tpu7x:2x2x1
jax: 0.10.0
libtpu: 0.0.40
codegen_flags: <defaults>
</compile_context>

<pallas_src>
import numpy as np
import jax
import jax.numpy as jnp
from jax import lax
from jax.experimental import pallas as pl
from jax.experimental.pallas import tpu as pltpu

# ---- problem constants (from the PyTorch module) ----
IN_CHANNELS = 32
OUT_CHANNELS = 16
KSIZE = 4
STRIDE = 2
PADDING = 1
OUTPUT_PADDING = 1

LANE = 128
TM_CAP = 2048       # max lane-tile of the flattened pixel dim (keeps VMEM tiny even double-buffered)


def _fused_parity_gemm_kernel(w_ref, b_ref, a_ref, o_ref):
    # w_ref: (Cout, 128)  packed 2x2xCin weights for this parity (transposed)
    # b_ref: (Cout, 1)    conv_bias - sub_bias (broadcast across lanes)
    # a_ref: (128, TM)    channel/tap-major patch slab for this parity & pixel tile
    # o_ref: (Cout, TM)   lane-dense output tile
    acc = jnp.dot(w_ref[...], a_ref[...], preferred_element_type=jnp.float32)
    o_ref[...] = jnp.tanh(acc + b_ref[...])


def conv_transpose_sub_tanh(x_nchw, weight, conv_bias, sub_bias):
    """
    x_nchw:   (N, Cin, H, W)        float32
    weight:   (Cin, Cout, K, K)     float32   (PyTorch ConvTranspose2d layout)
    conv_bias:(Cout,)               float32
    sub_bias: (Cout, 1, 1)          float32   (extra learned bias that is subtracted)
    returns:  (N, Cout, 2H+1, 2W+1) float32
    """
    N, Cin, H, W = x_nchw.shape
    Cout = weight.shape[1]
    K = weight.shape[2]

    H_out = (H - 1) * STRIDE - 2 * PADDING + K + OUTPUT_PADDING      # 2H + 1
    W_out = (W - 1) * STRIDE - 2 * PADDING + K + OUTPUT_PADDING      # 2W + 1
    Hp, Wp = H + 1, W + 1            # per-parity (over-)computed output extent
    M = N * Hp * Wp                  # flattened per-parity pixels
    KC = 2 * 2 * Cin                 # 128 -> exactly one MXU contraction pass

    # lane tiling of the flattened pixel dim
    M_round = ((M + LANE - 1) // LANE) * LANE
    TM = M_round if M_round <= TM_CAP else 512
    M_pad = ((M + TM - 1) // TM) * TM

    # ---- glue: channel-major padded input and the 9 shifted slabs (static slices) ----
    # pad 1 before / 2 after spatially; parity (pr,pc) windows start at offset (pr,pc)
    x_c = jnp.transpose(x_nchw, (1, 0, 2, 3))                        # (Cin, N, H, W)
    x_pad = jnp.pad(x_c, ((0, 0), (0, 0), (1, 2), (1, 2)))           # (Cin, N, H+3, W+3)
    slab = {}
    for r in range(3):
        for c in range(3):
            slab[(r, c)] = x_pad[:, :, r:r + Hp, c:c + Wp].reshape(Cin, M)

    # Per-parity A^T (128, M) with rows ordered (dh, dw, ic), and matching packed weights.
    # Tap mapping: output row oh = 2m+pr uses x_pad rows [m+pr, m+pr+1] against
    # kernel taps kh = 3-pr-2*dh (same in width).
    Wt = jnp.transpose(weight, (2, 3, 0, 1))                         # (kh, kw, Cin, Cout)
    A_list, W_list = [], []
    for pr in range(2):
        for pc in range(2):
            A_list.append(jnp.concatenate(
                [slab[(pr + dh, pc + dw)] for dh in range(2) for dw in range(2)],
                axis=0))                                             # (128, M)
            sub = Wt[3 - pr::-2, 3 - pc::-2]                         # (2, 2, Cin, Cout) in (dh, dw) order
            W_list.append(sub.reshape(KC, Cout).T)                   # (Cout, 128)

    A_all = jnp.stack(A_list, axis=0)                                # (4, 128, M)
    A_all = jnp.pad(A_all, ((0, 0), (0, 0), (0, M_pad - M)))
    W_all = jnp.stack(W_list, axis=0)                                # (4, Cout, 128)
    bias_eff = (conv_bias - sub_bias.reshape(-1)).reshape(Cout, 1)   # (Cout, 1)

    out = pl.pallas_call(
        _fused_parity_gemm_kernel,
        out_shape=jax.ShapeDtypeStruct((4, Cout, M_pad), jnp.float32),
        grid_spec=pltpu.PrefetchScalarGridSpec(
            num_scalar_prefetch=0,
            grid=(4, M_pad // TM),
            in_specs=[
                pl.BlockSpec((None, Cout, KC), lambda p, i: (p, 0, 0)),   # weights (per parity)
                pl.BlockSpec((Cout, 1), lambda p, i: (0, 0)),             # fused bias
                pl.BlockSpec((None, KC, TM), lambda p, i: (p, 0, i)),     # patch slab
            ],
            out_specs=pl.BlockSpec((None, Cout, TM), lambda p, i: (p, 0, i)),
        ),
        compiler_params=pltpu.CompilerParams(
            dimension_semantics=("parallel", "parallel")),
    )(W_all, bias_eff, A_all)

    # ---- interleave the 4 parity slabs back into NCHW (channel-major already) ----
    out = out[:, :, :M].reshape(4, Cout, N, Hp, Wp)
    y = jnp.zeros((N, Cout, H_out, W_out), jnp.float32)
    p = 0
    for pr in range(2):
        rows = Hp if pr == 0 else H          # number of output rows with oh % 2 == pr
        for pc in range(2):
            cols = Wp if pc == 0 else W
            slab_p = jnp.transpose(out[p, :, :, :rows, :cols], (1, 0, 2, 3))  # (N, Cout, rows, cols)
            y = y.at[:, :, pr::2, pc::2].set(slab_p)
            p += 1
    return y


def _reference(x_nchw, weight, conv_bias, sub_bias):
    """Pure-JAX reference for the same semantics (lax dilated conv)."""
    x_nhwc = jnp.transpose(x_nchw, (0, 2, 3, 1))
    Wf = jnp.transpose(weight, (2, 3, 0, 1))[::-1, ::-1]             # HWIO, flipped
    pad_lo = KSIZE - 1 - PADDING
    pad_hi = KSIZE - 1 - PADDING + OUTPUT_PADDING
    y = lax.conv_general_dilated(
        x_nhwc, Wf, window_strides=(1, 1),
        padding=((pad_lo, pad_hi), (pad_lo, pad_hi)),
        lhs_dilation=(STRIDE, STRIDE),
        dimension_numbers=("NHWC", "HWIO", "NHWC"),
    )
    y = jnp.tanh(y + (conv_bias - sub_bias.reshape(-1))[None, None, None, :])
    return jnp.transpose(y, (0, 3, 1, 2))


if __name__ == "__main__":
    key = jax.random.PRNGKey(0)
    k_x, k_w, k_b, k_sb = jax.random.split(key, 4)

    N, H, W = 2, 16, 16
    x = jax.random.normal(k_x, (N, IN_CHANNELS, H, W), dtype=jnp.float32)

    # deterministic parameter init (shapes follow nn.ConvTranspose2d + extra bias)
    fan = IN_CHANNELS * KSIZE * KSIZE
    bound = 1.0 / np.sqrt(fan)
    weight = jax.random.uniform(k_w, (IN_CHANNELS, OUT_CHANNELS, KSIZE, KSIZE),
                                dtype=jnp.float32, minval=-bound, maxval=bound)
    conv_bias = jax.random.uniform(k_b, (OUT_CHANNELS,), dtype=jnp.float32,
                                   minval=-bound, maxval=bound)
    sub_bias = jax.random.normal(k_sb, (OUT_CHANNELS, 1, 1), dtype=jnp.float32)

    fn = jax.jit(conv_transpose_sub_tanh)
    out = jax.block_until_ready(fn(x, weight, conv_bias, sub_bias))
    ref = jax.block_until_ready(_reference(x, weight, conv_bias, sub_bias))

    assert out.shape == (N, OUT_CHANNELS, 2 * H + 1, 2 * W + 1), out.shape
    np.testing.assert_allclose(np.asarray(out), np.asarray(ref), atol=1e-5, rtol=1e-5)
    print("KERNEL_OK")
</pallas_src>

<mosaic_0001>
module attributes {stable_mosaic.version = 11 : i64} {
  func.func @_fused_parity_gemm_kernel(%arg0: i32, %arg1: i32, %arg2: memref<1x16x128xf32, #tpu.memory_space<vmem>>, %arg3: memref<16x1xf32, #tpu.memory_space<vmem>>, %arg4: memref<1x128x640xf32, #tpu.memory_space<vmem>>, %arg5: memref<1x16x640xf32, #tpu.memory_space<vmem>>) attributes {dimension_semantics = [#tpu.dimension_semantics<parallel>, #tpu.dimension_semantics<parallel>], iteration_bounds = array<i64: 4, 1>, scalar_prefetch = 0 : i64, scratch_operands = 0 : i64, tpu.core_type = #tpu.core_type<tc>, window_params = [{transform_indices = @transform_0, window_bounds = array<i64: 1, 16, 128>}, {pipeline_mode = #tpu.pipeline_mode<synchronous>, transform_indices = @transform_1, window_bounds = array<i64: 16, 1>}, {transform_indices = @transform_2, window_bounds = array<i64: 1, 128, 640>}, {transform_indices = @transform_3, window_bounds = array<i64: 1, 16, 640>}]} {
    %c0 = arith.constant 0 : index
    %c0_0 = arith.constant 0 : index
    %c0_1 = arith.constant 0 : index
    %0 = vector.load %arg2[%c0, %c0_0, %c0_1] : memref<1x16x128xf32, #tpu.memory_space<vmem>>, vector<1x16x128xf32>
    %1 = vector.shape_cast %0 : vector<1x16x128xf32> to vector<16x128xf32>
    %c0_2 = arith.constant 0 : index
    %c0_3 = arith.constant 0 : index
    %c0_4 = arith.constant 0 : index
    %2 = vector.load %arg4[%c0_2, %c0_3, %c0_4] : memref<1x128x640xf32, #tpu.memory_space<vmem>>, vector<1x128x640xf32>
    %3 = vector.shape_cast %2 : vector<1x128x640xf32> to vector<128x640xf32>
    %cst = arith.constant dense<0.000000e+00> : vector<16x640xf32>
    %4 = tpu.matmul %1, %3, %cst {dimension_numbers = #tpu.dot_dimension_numbers<[1], [0], [0], [1], [0, 0, 1, 1], [], []>} : vector<16x128xf32>, vector<128x640xf32>, vector<16x640xf32> -> vector<16x640xf32>
    %c0_5 = arith.constant 0 : index
    %c0_6 = arith.constant 0 : index
    %5 = vector.load %arg3[%c0_5, %c0_6] : memref<16x1xf32, #tpu.memory_space<vmem>>, vector<16x1xf32>
    %6 = vector.broadcast %5 : vector<16x1xf32> to vector<16x640xf32>
    %7 = arith.addf %4, %6 : vector<16x640xf32>
    %8 = math.tanh %7 : vector<16x640xf32>
    %c0_7 = arith.constant 0 : index
    %c0_8 = arith.constant 0 : index
    %c0_9 = arith.constant 0 : index
    %9 = vector.load %arg5[%c0_7, %c0_8, %c0_9] : memref<1x16x640xf32, #tpu.memory_space<vmem>>, vector<1x16x640xf32>
    %10 = vector.shape_cast %9 : vector<1x16x640xf32> to vector<16x640xf32>
    %11 = vector.shape_cast %8 : vector<16x640xf32> to vector<1x16x640xf32>
    tpu.vector_store %arg5[%c0_7, %c0_8, %c0_9], %11 {strides = array<i32>} : memref<1x16x640xf32, #tpu.memory_space<vmem>>, vector<1x16x640xf32>,
    return
  }
  func.func @transform_0(%arg0: i32, %arg1: i32) -> (i32, i32, i32) {
    %c0_i32 = arith.constant 0 : i32
    %c0_i32_0 = arith.constant 0 : i32
    %c0_i32_1 = arith.constant 0 : i32
    return %arg0, %c0_i32, %c0_i32_0 : i32, i32, i32
  }
  func.func @transform_1(%arg0: i32, %arg1: i32) -> (i32, i32) {
    %c0_i32 = arith.constant 0 : i32
    %c0_i32_0 = arith.constant 0 : i32
    %c0_i32_1 = arith.constant 0 : i32
    return %c0_i32, %c0_i32_0 : i32, i32
  }
  func.func @transform_2(%arg0: i32, %arg1: i32) -> (i32, i32, i32) {
    %c0_i32 = arith.constant 0 : i32
    %c0_i32_0 = arith.constant 0 : i32
    return %arg0, %c0_i32, %arg1 : i32, i32, i32
  }
  func.func @transform_3(%arg0: i32, %arg1: i32) -> (i32, i32, i32) {
    %c0_i32 = arith.constant 0 : i32
    %c0_i32_0 = arith.constant 0 : i32
    return %arg0, %c0_i32, %arg1 : i32, i32, i32
  }
}

</mosaic_0001>

<bundles_post_ra>
// kernel: conv_transpose_sub_tanh.1
= control target key start
LH: loop header
LB: loop body
LE: loop exit
PB: predicated region body
PF: predicated region fallthrough
CT: control target
= control target key end

     0   :  { %s928_s12 = smov 0   ;;  %s930_s13 = smov 0   ;;  %s1073_s0 = inlined_call_operand.vmem [shape: f32[4,16,128], index: 0, kind: input, shape index: {}]   ;;  %s1074_s1 = inlined_call_operand.vmem [shape: f32[16,1], index: 1, kind: input, shape index: {}]   ;;  %s1075_s2 = inlined_call_operand.vmem [shape: f32[4,128,640], index: 2, kind: input, shape index: {}]   ;;  %s1076_s3 = inlined_call_operand.vmem [shape: f32[4,16,640], index: 3, kind: output, shape index: {}]  }
   0x1   :  { %s932_s14 = smov 0  }
   0x2 LB: > { %s25_s15 = sadd.s32 1, %s900_s13  ;;  %p676_p0 = scmp.ge.s32.totalorder %s904_s14, 1  ;;  %s904_s14 = sphi %s932_s14, %s13_s14   ;;  %s900_s13 = sphi %s930_s13, %s1078_s13   ;;  %s896_s12 = sphi %s928_s12, %s1077_s12  }
   0x3   : > { %p27_p1 = scmp.ge.s32.totalorder %s25_s15, 4  ;;  %p168_p2 = scmp.lt.s32.totalorder %s904_s14, 5 }
   0x5   : > { %s1080_s15 = smov (%p27_p1, %s25_s15), 0  ;;  %p169_p3 = pnand %p676_p0, %p168_p2 }
   0x6   : > { %p205_p4 = scmp.lt.s32.totalorder (!%p169_p3), %s896_s12, 3  ;;  %v312_v0 = vld [vmem:[%s1074_s1] sm:$0xff] (!%p169_p3)  ;;  %v906_v1 = vmov (!%p169_p3), 0.0   ;;  %v907_v2 = vmov (!%p169_p3), 0   ;;  %v313_v3 = vld [vmem:[%s1074_s1 + $0x8] sm:$0xff] (!%p169_p3) }
   0x7   : > { %172 = sbr.rel (%p169_p3) target bundleno = 312 (0x138), region = 32  ;;  %388 = vmatprep.mubr.f32.mxu0 (!%p169_p3), %v906_v1  ;;  %465 = vmatprep.mubr.f32.mxu1 (!%p169_p3), %v906_v1 }
   0x8   : > { %861 = vset.pattern.permute.xlu0 (!%p169_p3), %v907_v2 }
   0x9   : > { %316 = vperm.xlu0 (!%p169_p3), %861, %v312_v0  }
   0xd   : > { %321 = vperm.xlu0 (!%p169_p3), %861, %v313_v3  }
   0xe   : > { %s1082_s12 = smov (!%p205_p4, %s896_s12), 3 }
   0xf   : > { %s833_s18 = smul.u32 640, %s1082_s12  ;;  %s683_s24 = sshll.u32 %s1082_s12, 4 }
  0x10   : > { %s209_s27 = scalar_lea.vmem %s1073_s0, %s683_s24  ;;  %s834_s28 = smul.u32 80, %s1082_s12 }
  0x11   : > { %s960_s23 = scalar_lea.vmem %s1075_s2, %s833_s18 }
  0x12   : > { %v233_v4 = vld [vmem:[%s960_s23 + $0x8] sm:$0xff]  ;;  %v238_v5 = vld [vmem:[%s960_s23 + $0x30] sm:$0xff]  ;;  %v232_v6 = vld [vmem:[%s960_s23] sm:$0xff]  ;;  %s1052_s4 = scalar_lea.vmem %s1076_s3, %s834_s28 }
  0x13   : > { %v737_v7 = vpack.c.bf16 %v238_v5, %v233_v4  ;;  %v237_v8 = vld [vmem:[%s960_s23 + $0x28] sm:$0xff]  ;;  %v243_v9 = vld [vmem:[%s960_s23 + $0x58] sm:$0xff]  ;;  %v248_v10 = vld [vmem:[%s960_s23 + $0x80] sm:$0xff] }
  0x14   : > { %v739_v11 = vpack.c.bf16 %v237_v8, %v232_v6  ;;  %v741_v12 = vpack.c.bf16 %v248_v10, %v243_v9  ;;  %v242_v13 = vld [vmem:[%s960_s23 + $0x50] sm:$0xff]  ;;  %v247_v14 = vld [vmem:[%s960_s23 + $0x78] sm:$0xff]  ;;  %v253_v15 = vld [vmem:[%s960_s23 + $0xa8] sm:$0xff] }
  0x15   : > { %738 = vmatprep.subr.bf16.mxu0 %v737_v7  ;;  %v258_v16 = vld [vmem:[%s960_s23 + $0xd0] sm:$0xff]  ;;  %v743_v17 = vpack.c.bf16 %v247_v14, %v242_v13  ;;  %v252_v19 = vld [vmem:[%s960_s23 + $0xa0] sm:$0xff]  ;;  %v257_v20 = vld [vmem:[%s960_s23 + $0xc8] sm:$0xff] }
  0x16   : > { %740 = vmatpush1.bf16.msra.mxu0 %v739_v11  ;;  %v745_v18 = vpack.c.bf16 %v258_v16, %v253_v15  ;;  %v263_v21 = vld [vmem:[%s960_s23 + $0xf8] sm:$0xff]  ;;  %v268_v22 = vld [vmem:[%s960_s23 + $0x120] sm:$0xff]  ;;  %v747_v23 = vpack.c.bf16 %v257_v20, %v252_v19  ;;  %v262_v24 = vld [vmem:[%s960_s23 + $0xf0] sm:$0xff] }
  0x17   : > { %742 = vmatprep.subr.bf16.mxu0 %v741_v12  ;;  %v235_v25 = vld [vmem:[%s960_s23 + $0x18] sm:$0xff]  ;;  %v749_v26 = vpack.c.bf16 %v268_v22, %v263_v21  ;;  %v273_v28 = vld [vmem:[%s960_s23 + $0x148] sm:$0xff]  ;;  %v240_v29 = vld [vmem:[%s960_s23 + $0x40] sm:$0xff] }
  0x18   : > { %v267_v27 = vld [vmem:[%s960_s23 + $0x118] sm:$0xff]  ;;  %v278_v30 = vld [vmem:[%s960_s23 + $0x170] sm:$0xff]  ;;  %v769_v31 = vpack.c.bf16 %v240_v29, %v235_v25  ;;  %v245_v35 = vld [vmem:[%s960_s23 + $0x68] sm:$0xff] }
  0x19   : > { %v234_v32 = vld [vmem:[%s960_s23 + $0x10] sm:$0xff]  ;;  %v239_v33 = vld [vmem:[%s960_s23 + $0x38] sm:$0xff]  ;;  %v751_v37 = vpack.c.bf16 %v267_v27, %v262_v24  ;;  %v272_v38 = vld [vmem:[%s960_s23 + $0x140] sm:$0xff]  ;;  %v753_v42 = vpack.c.bf16 %v278_v30, %v273_v28 }
  0x1a   : > { %744 = vmatpush1.bf16.msra.mxu0 %v743_v17  ;;  %v771_v34 = vpack.c.bf16 %v239_v33, %v234_v32  ;;  %v250_v36 = vld [vmem:[%s960_s23 + $0x90] sm:$0xff]  ;;  %v277_v39 = vld [vmem:[%s960_s23 + $0x168] sm:$0xff]  ;;  %770 = vmatprep.subr.bf16.mxu1 %v769_v31  ;;  %v244_v41 = vld [vmem:[%s960_s23 + $0x60] sm:$0xff] }
  0x1b   : > { %746 = vmatprep.subr.bf16.mxu0 %v745_v18  ;;  %v773_v40 = vpack.c.bf16 %v250_v36, %v245_v35  ;;  %v249_v43 = vld [vmem:[%s960_s23 + $0x88] sm:$0xff]  ;;  %v255_v44 = vld [vmem:[%s960_s23 + $0xb8] sm:$0xff]  ;;  %v260_v45 = vld [vmem:[%s960_s23 + $0xe0] sm:$0xff]  ;;  %v755_v54 = vpack.c.bf16 %v277_v39, %v272_v38 }
  0x1c   : > { %772 = vmatpush1.bf16.msra.mxu1 %v771_v34  ;;  %v283_v46 = vld [vmem:[%s960_s23 + $0x198] sm:$0xff]  ;;  %v288_v47 = vld [vmem:[%s960_s23 + $0x1c0] sm:$0xff]  ;;  %v775_v48 = vpack.c.bf16 %v249_v43, %v244_v41  ;;  %v777_v49 = vpack.c.bf16 %v260_v45, %v255_v44  ;;  %v254_v50 = vld [vmem:[%s960_s23 + $0xb0] sm:$0xff] }
  0x1d   : > { %774 = vmatprep.subr.bf16.mxu1 %v773_v40  ;;  %v259_v51 = vld [vmem:[%s960_s23 + $0xd8] sm:$0xff]  ;;  %v265_v52 = vld [vmem:[%s960_s23 + $0x108] sm:$0xff]  ;;  %v270_v53 = vld [vmem:[%s960_s23 + $0x130] sm:$0xff]  ;;  %v757_v55 = vpack.c.bf16 %v288_v47, %v283_v46 }
  0x1e   : > { %748 = vmatpush1.bf16.msra.mxu0 %v747_v23  ;;  %v282_v56 = vld [vmem:[%s960_s23 + $0x190] sm:$0xff]  ;;  %v287_v57 = vld [vmem:[%s960_s23 + $0x1b8] sm:$0xff]  ;;  %v293_v58 = vld [vmem:[%s960_s23 + $0x1e8] sm:$0xff]  ;;  %v779_v59 = vpack.c.bf16 %v259_v51, %v254_v50  ;;  %v781_v61 = vpack.c.bf16 %v270_v53, %v265_v52 }
  0x1f   : > { %750 = vmatprep.subr.bf16.mxu0 %v749_v26  ;;  %v298_v60 = vld [vmem:[%s960_s23 + $0x210] sm:$0xff]  ;;  %v264_v62 = vld [vmem:[%s960_s23 + $0x100] sm:$0xff]  ;;  %v269_v63 = vld [vmem:[%s960_s23 + $0x128] sm:$0xff]  ;;  %v759_v3 = vpack.c.bf16 %v287_v57, %v282_v56 }
  0x20   : > { %776 = vmatpush1.bf16.msra.mxu1 %v775_v48  ;;  %v275_v0 = vld [vmem:[%s960_s23 + $0x158] sm:$0xff]  ;;  %v280_v2 = vld [vmem:[%s960_s23 + $0x180] sm:$0xff]  ;;  %v761_v4 = vpack.c.bf16 %v298_v60, %v293_v58  ;;  %v297_v6 = vld [vmem:[%s960_s23 + $0x208] sm:$0xff]  ;;  %v783_v8 = vpack.c.bf16 %v269_v63, %v264_v62 }
  0x21   : > { %778 = vmatprep.subr.bf16.mxu1 %v777_v49  ;;  %v292_v5 = vld [vmem:[%s960_s23 + $0x1e0] sm:$0xff]  ;;  %v303_v7 = vld [vmem:[%s960_s23 + $0x238] sm:$0xff]  ;;  %v785_v10 = vpack.c.bf16 %v280_v2, %v275_v0  ;;  %v274_v11 = vld [vmem:[%s960_s23 + $0x150] sm:$0xff] }
  0x22   : > { %752 = vmatpush1.bf16.msra.mxu0 %v751_v37  ;;  %v308_v9 = vld [vmem:[%s960_s23 + $0x260] sm:$0xff]  ;;  %v279_v12 = vld [vmem:[%s960_s23 + $0x178] sm:$0xff]  ;;  %v285_v13 = vld [vmem:[%s960_s23 + $0x1a8] sm:$0xff]  ;;  %v763_v15 = vpack.c.bf16 %v297_v6, %v292_v5 }
  0x23   : > { %754 = vmatprep.subr.bf16.mxu0 %v753_v42  ;;  %v290_v14 = vld [vmem:[%s960_s23 + $0x1d0] sm:$0xff]  ;;  %v765_v16 = vpack.c.bf16 %v308_v9, %v303_v7  ;;  %v307_v18 = vld [vmem:[%s960_s23 + $0x258] sm:$0xff]  ;;  %v236_v19 = vld [vmem:[%s960_s23 + $0x20] sm:$0xff]  ;;  %v787_v20 = vpack.c.bf16 %v279_v12, %v274_v11 }
  0x24   : > { %780 = vmatpush1.bf16.msra.mxu1 %v779_v59  ;;  %v302_v17 = vld [vmem:[%s960_s23 + $0x230] sm:$0xff]  ;;  %v241_v21 = vld [vmem:[%s960_s23 + $0x48] sm:$0xff]  ;;  %v789_v22 = vpack.c.bf16 %v290_v14, %v285_v13  ;;  %v284_v23 = vld [vmem:[%s960_s23 + $0x1a0] sm:$0xff] }
  0x25   : > { %782 = vmatprep.subr.bf16.mxu1 %v781_v61  ;;  %v289_v24 = vld [vmem:[%s960_s23 + $0x1c8] sm:$0xff]  ;;  %v295_v25 = vld [vmem:[%s960_s23 + $0x1f8] sm:$0xff]  ;;  %v300_v26 = vld [vmem:[%s960_s23 + $0x220] sm:$0xff]  ;;  %v767_v27 = vpack.c.bf16 %v307_v18, %v302_v17  ;;  %v801_v28 = vpack.c.bf16 %v241_v21, %v236_v19 }
  0x26   : > { %756 = vmatpush1.bf16.msra.mxu0 %v755_v54  ;;  %v246_v29 = vld [vmem:[%s960_s23 + $0x70] sm:$0xff]  ;;  %v791_v30 = vpack.c.bf16 %v289_v24, %v284_v23  ;;  %v251_v31 = vld [vmem:[%s960_s23 + $0x98] sm:$0xff]  ;;  %v793_v32 = vpack.c.bf16 %v300_v26, %v295_v25  ;;  %v305_v35 = vld [vmem:[%s960_s23 + $0x248] sm:$0xff] }
  0x27   : > { %758 = vmatprep.subr.bf16.mxu0 %v757_v55  ;;  %v294_v33 = vld [vmem:[%s960_s23 + $0x1f0] sm:$0xff]  ;;  %v299_v34 = vld [vmem:[%s960_s23 + $0x218] sm:$0xff]  ;;  %v230_v37 = vld [vmem:[%s209_s27] sm:$0xff]  ;;  %v805_v38 = vpack.c.bf16 %v251_v31, %v246_v29 }
  0x28   : > { %784 = vmatpush1.bf16.msra.mxu1 %v783_v8  ;;  %v310_v36 = vld [vmem:[%s960_s23 + $0x270] sm:$0xff]  ;;  %v256_v39 = vld [vmem:[%s960_s23 + $0xc0] sm:$0xff]  ;;  %v795_v40 = vpack.c.bf16 %v299_v34, %v294_v33  ;;  %v261_v41 = vld [vmem:[%s960_s23 + $0xe8] sm:$0xff] }
  0x29   : > { %786 = vmatprep.subr.bf16.mxu1 %v785_v10  ;;  %v797_v42 = vpack.c.bf16 %v310_v36, %v305_v35  ;;  %v304_v43 = vld [vmem:[%s960_s23 + $0x240] sm:$0xff]  ;;  %v309_v44 = vld [vmem:[%s960_s23 + $0x268] sm:$0xff]  ;;  %v809_v46 = vpack.c.bf16 %v261_v41, %v256_v39  ;;  %v266_v48 = vld [vmem:[%s960_s23 + $0x110] sm:$0xff] }
  0x2a   : > { %760 = vmatpush1.bf16.msra.mxu0 %v759_v3  ;;  %v231_v45 = vld [vmem:[%s209_s27 + $0x8] sm:$0xff]  ;;  %v799_v47 = vpack.c.bf16 %v309_v44, %v304_v43  ;;  %v271_v49 = vld [vmem:[%s960_s23 + $0x138] sm:$0xff]  ;;  %v276_v51 = vld [vmem:[%s960_s23 + $0x160] sm:$0xff] }
  0x2b   : > { %762 = vmatprep.subr.bf16.mxu0 %v761_v4  ;;  %v813_v50 = vpack.c.bf16 %v271_v49, %v266_v48  ;;  %v281_v52 = vld [vmem:[%s960_s23 + $0x188] sm:$0xff]  ;;  %v286_v54 = vld [vmem:[%s960_s23 + $0x1b0] sm:$0xff]  ;;  %v291_v55 = vld [vmem:[%s960_s23 + $0x1d8] sm:$0xff] }
  0x2c   : > { %788 = vmatpush1.bf16.msra.mxu1 %v787_v20  ;;  %v817_v53 = vpack.c.bf16 %v281_v52, %v276_v51  ;;  %v821_v56 = vpack.c.bf16 %v291_v55, %v286_v54  ;;  %v296_v57 = vld [vmem:[%s960_s23 + $0x200] sm:$0xff]  ;;  %v301_v58 = vld [vmem:[%s960_s23 + $0x228] sm:$0xff]  ;;  %v306_v60 = vld [vmem:[%s960_s23 + $0x250] sm:$0xff] }
  0x2d   : > { %790 = vmatprep.subr.bf16.mxu1 %v789_v22  ;;  %v825_v59 = vpack.c.bf16 %v301_v58, %v296_v57  ;;  %v311_v61 = vld [vmem:[%s960_s23 + $0x278] sm:$0xff] }
  0x2e   : > { %764 = vmatpush1.bf16.msra.mxu0 %v763_v15  ;;  %v829_v62 = vpack.c.bf16 %v311_v61, %v306_v60 }
  0x2f   : > { %766 = vmatprep.subr.bf16.mxu0 %v765_v16 }
  0x30   : > { %792 = vmatpush1.bf16.msra.mxu1 %v791_v30 }
  0x31   : > { %794 = vmatprep.subr.bf16.mxu1 %v793_v32 }
  0x32   : > { %768 = vmatpush1.bf16.msra.mxu0 %v767_v27 }
  0x33   : > { %802 = vmatprep.subr.bf16.mxu0 %v801_v28 }
  0x34   : > { %796 = vmatpush1.bf16.msra.mxu1 %v795_v40 }
  0x35   : > { %389 = vmatmul.mubr.f32.vlgmr.msra.gmra.mrb[0].mxu0 %v230_v37  ;;  %798 = vmatprep.subr.bf16.mxu1 %v797_v42 }
  0x36   : > { %804 = vmatpush3.bf16.msra.mxu0 %v801_v28  ;;  %394 = vmatprep.mubr.f32.mxu0 %v906_v1 }
  0x37   : > { %806 = vmatprep.subr.bf16.mxu0 %v805_v38 }
  0x38   : > { %800 = vmatpush1.bf16.msra.mxu1 %v799_v47 }
  0x39   : > { %395 = vmatmul.mubr.f32.gmra.mrb[2].mxu0 %v231_v45 }
  0x3a   : > { %808 = vmatpush3.bf16.msra.mxu0 %v805_v38  ;;  %734 = vmatprep.mubr.f32.mxu0 %v230_v37 }
  0x3b   : > { %810 = vmatprep.subr.bf16.mxu0 %v809_v46  ;;  %466 = vmatmul.mubr.f32.vlgmr.msra.gmra.mrb[0].mxu1 %v230_v37 }
  0x3c   : > { %471 = vmatprep.mubr.f32.mxu1 %v906_v1 }
  0x3e   : > { %812 = vmatpush3.bf16.msra.mxu0 %v809_v46 }
  0x3f   : > { %814 = vmatprep.subr.bf16.mxu0 %v813_v50  ;;  %472 = vmatmul.mubr.f32.gmra.mrb[2].mxu1 %v231_v45 }
  0x42   : > { %816 = vmatpush3.bf16.msra.mxu0 %v813_v50 }
  0x43   : > { %818 = vmatprep.subr.bf16.mxu0 %v817_v53 }
  0x46   : > { %820 = vmatpush3.bf16.msra.mxu0 %v817_v53 }
  0x47   : > { %822 = vmatprep.subr.bf16.mxu0 %v821_v56 }
  0x4a   : > { %824 = vmatpush3.bf16.msra.mxu0 %v821_v56 }
  0x4b   : > { %826 = vmatprep.subr.bf16.mxu0 %v825_v59 }
  0x4e   : > { %828 = vmatpush3.bf16.msra.mxu0 %v825_v59 }
  0x4f   : > { %830 = vmatprep.subr.bf16.mxu0 %v829_v62 }
  0x52   : > { %832 = vmatpush3.bf16.msra.mxu0 %v829_v62 }
  0x55   : > { %735 = vmatmul.mubr.f32.vlgmr.msra.gmra.mrb[4].mxu0 %v231_v45 }
  0x88   : > { %v317_v1 = vpop.permute.xlu0 %316 }
  0x8c   : > { %v322_v4 = vpop.permute.xlu0 %321 }
 0x108   : > { %v390_v63 = vpop.f32.mrb[0].mxu0 }
 0x109   : > { %v391_v0 = vadd.f32 %v390_v63, %v317_v1  ;;  %v392_v2 = vpop.f32.mrb[1].mxu0 }
 0x10a   : > { %v393_v3 = vadd.f32 %v392_v2, %v317_v1 }
 0x10b   : > { %862 = vtanh.f32 %v391_v0 }
 0x10c   : > { %864 = vtanh.f32 %v393_v3  ;;  %v396_v5 = vpop.f32.mrb[2].mxu0 }
 0x10d   : > { %v397_v6 = vadd.f32 %v396_v5, %v322_v4  ;;  %v398_v7 = vpop.f32.mrb[3].mxu0 }
 0x10e   : > { %v399_v8 = vadd.f32 %v398_v7, %v322_v4  ;;  %v467_v9 = vpop.f32.mrb[0].mxu1 }
 0x10f   : > { %866 = vtanh.f32 %v397_v6  ;;  %v468_v10 = vadd.f32 %v467_v9, %v317_v1  ;;  %v469_v11 = vpop.f32.mrb[1].mxu1 }
 0x110   : > { %868 = vtanh.f32 %v399_v8  ;;  %v470_v12 = vadd.f32 %v469_v11, %v317_v1 }
 0x111   : > { %870 = vtanh.f32 %v468_v10 }
 0x112   : > { %872 = vtanh.f32 %v470_v12  ;;  %v473_v14 = vpop.f32.mrb[2].mxu1 }
 0x113   : > { %v474_v16 = vadd.f32 %v473_v14, %v322_v4  ;;  %v475_v17 = vpop.f32.mrb[3].mxu1 }
 0x114   : > { %v476_v18 = vadd.f32 %v475_v17, %v322_v4 }
 0x115   : > { %v863_v13 = vpop.eup %862  ;;  %874 = vtanh.f32 %v474_v16 }
 0x116   : > { %v865_v15 = vpop.eup %864  ;;  %563 = vst [vmem:[%s1052_s4] sm:$0xff] %v863_v13  ;;  %876 = vtanh.f32 %v476_v18 }
 0x117   : > { %564 = vst [vmem:[%s1052_s4 + $0x8] sm:$0xff] %v865_v15 }
 0x119   : > { %v867_v19 = vpop.eup %866 }
 0x11a   : > { %v869_v20 = vpop.eup %868  ;;  %568 = vst [vmem:[%s1052_s4 + $0x28] sm:$0xff] %v867_v19 }
 0x11b   : > { %569 = vst [vmem:[%s1052_s4 + $0x30] sm:$0xff] %v869_v20  ;;  %v871_v21 = vpop.eup %870 }
 0x11c   : > { %v873_v22 = vpop.eup %872  ;;  %565 = vst [vmem:[%s1052_s4 + $0x10] sm:$0xff] %v871_v21 }
 0x11d   : > { %566 = vst [vmem:[%s1052_s4 + $0x18] sm:$0xff] %v873_v22 }
 0x11f   : > { %v875_v23 = vpop.eup %874 }
 0x120   : > { %v877_v24 = vpop.eup %876  ;;  %570 = vst [vmem:[%s1052_s4 + $0x38] sm:$0xff] %v875_v23 }
 0x121   : > { %571 = vst [vmem:[%s1052_s4 + $0x40] sm:$0xff] %v877_v24 }
 0x128   : > { %v736_v25 = vpop.f32.mrb[4].mxu0 }
 0x129   : > { %v550_v26 = vadd.f32 %v736_v25, %v322_v4  ;;  %v544_v27 = vpop.f32.mrb[5].mxu0 }
 0x12a   : > { %v545_v28 = vadd.f32 %v544_v27, %v317_v1 }
 0x12b   : > { %878 = vtanh.f32 %v550_v26 }
 0x12c   : > { %880 = vtanh.f32 %v545_v28 }
 0x135   : > { %v879_v29 = vpop.eup %878 }
 0x136   : > { %v881_v30 = vpop.eup %880  ;;  %572 = vst [vmem:[%s1052_s4 + $0x48] sm:$0xff] %v879_v29 }
 0x137   : > { %567 = vst [vmem:[%s1052_s4 + $0x20] sm:$0xff] %v881_v30 }
 0x138 PF: > { %s13_s14 = sadd.s32 1, %s904_s14   ;;  %s1077_s12 = smov %s900_s13 }
 0x139   : > { %p10_p5 = scmp.ge.s32.totalorder %s13_s14, 6   ;;  %s1078_s13 = smov %s1080_s15 }
 0x13b   :  { %12 = sbr.rel (!%p10_p5) target bundleno = 2 (0x2), region = 65 }

// kernel: squeeze.4
= control target key start
LH: loop header
LB: loop body
LE: loop exit
PB: predicated region body
PF: predicated region fallthrough
CT: control target
= control target key end

     0   :  { %s1375_s10 = smov 120   ;;  %s1376_s11 = smov 121   ;;  %vm771_vm0 = vcmask 965632   ;;  %vm822_vm1 = vcmask 973824   ;;  %vm874_vm2 = vcmask 1031168   ;;  %vm926_vm3 = vcmask 1039360   ;;  %s2778_s0 = inlined_call_operand.vmem [shape: f32[1,16,578], index: 0, kind: input, shape index: {}]   ;;  %s2779_s1 = inlined_call_operand.vmem [shape: f32[16,2,17,17], index: 1, kind: output, shape index: {}]  }
   0x1   :  { %v1421_v0 = vld [vmem:[%s2778_s0 + $0x8] sm:$0xff]   ;;  %v1426_v1 = vld.sshfl [vmem:[%s2778_s0 + $0x18] sm:$0xff pattern:$0x67452301]   ;;  %v1433_v2 = vld [vmem:[%s2778_s0 + $0x30] sm:$0xff]   ;;  %s1377_s20 = smov 113  }
   0x2   :  { %47 = vrot.lane.b32.xlu1 %v1421_v0, %s1375_s10  ;;  %21 = vrot.lane.b32.xlu0 %v1426_v1, %s1376_s11  ;;  %v1438_v3 = vld.sshfl [vmem:[%s2778_s0 + $0x40] sm:$0xff pattern:$0x67452301]   ;;  %v1445_v4 = vld [vmem:[%s2778_s0 + $0x48] sm:$0xff]   ;;  %s1378_s25 = smov 112   ;;  %s1379_s30 = smov 111  }
   0x3   :  { %v1450_v5 = vld [vmem:[%s2778_s0 + $0x20] sm:$0xff]   ;;  %v1457_v6 = vld.sshfl [vmem:[%s2778_s0 + $0x38] sm:$0xff pattern:$0x67452301]   ;;  %v1469_v8 = vld [vmem:[%s2778_s0 + $0x28] sm:$0xff]   ;;  %s1380_s2 = smov 104  }
   0x4   :  { %v1462_v7 = vld.sshfl [vmem:[%s2778_s0 + $0x10] sm:$0xff pattern:$0x67452301]   ;;  %v1474_v9 = vld [vmem:[%s2778_s0] sm:$0xff]   ;;  %s1381_s3 = smov 103   ;;  %s1382_s4 = smov 96   ;;  %v798_v14 = vsel %vm771_vm0, %v1438_v3, %v1457_v6  ;;  %v849_v16 = vsel %vm822_vm1, %v1433_v2, %v1469_v8 }
   0x5   :  { %s1383_s5 = smov 95   ;;  %s1384_s6 = smov 94   ;;  %v1491_v10 = vld [vmem:[%s2778_s0 + $0x40] sm:$0xff]   ;;  %v1496_v11 = vld [vmem:[%s2778_s0 + $0x18] sm:$0xff]   ;;  %v772_v12 = vsel %vm771_vm0, %v1426_v1, %v1462_v7  ;;  %v823_v13 = vsel %vm822_vm1, %v1421_v0, %v1474_v9  ;;  %v1323_v17 = vld [vmem:[%s2778_s0 + $0x10] sm:$0xff]   ;;  %vm3_vm4 = vcmask 138240  }
   0x6   :  { %60 = vrot.lane.b32.xlu1 %v1433_v2, %s1375_s10  ;;  %34 = vrot.lane.b32.xlu0 %v1438_v3, %s1376_s11  ;;  %s1385_s11 = smov 87   ;;  %s1386_s12 = smov 86   ;;  %v875_v15 = vsel %vm874_vm2, %v1450_v5, %v1496_v11  ;;  %v927_v18 = vsel %vm926_vm3, %v1323_v17, %v1421_v0  ;;  %v901_v19 = vsel %vm874_vm2, %v1445_v4, %v1491_v10  ;;  %v1333_v20 = vld [vmem:[%s2778_s0 + $0x38] sm:$0xff]   ;;  %v2_v24 = vld [vmem:[%s2778_s0] sm:$0xff]   ;;  %vm775_vm5 = vcmask 80896  }
   0x7   :  { %s1387_s13 = smov 79   ;;  %s1388_s14 = smov 78   ;;  %v953_v21 = vsel %vm926_vm3, %v1333_v20, %v1433_v2  ;;  %v974_v25 = vld [vmem:[%s2778_s0 + $0x28] sm:$0xff]   ;;  %4 = vst.msk [vmem:[%s2779_s1] ss:$48 sm:$0x3] %vm3_vm4, %v2_v24  }
   0x8   :  { %s1389_s15 = smov 77   ;;  %s1390_s16 = smov 70   ;;  %5 = vst.msk [vmem:[%s2779_s1] ss:$48 sm:$0xc] %vm3_vm4, %v2_v24   ;;  %vm784_vm6 = vcmask 138320  }
   0x9   :  { %s1391_s17 = smov 69   ;;  %s1392_s18 = smov 61   ;;  %6 = vst.msk [vmem:[%s2779_s1] ss:$48 sm:$0x30] %vm3_vm4, %v2_v24   ;;  %vm826_vm7 = vcmask 72704  }
   0xa   :  { %86 = vrot.lane.b32.xlu1 %v1445_v4, %s1377_s20  ;;  %73 = vrot.lane.b32.xlu0 %v1450_v5, %s1377_s20  ;;  %s1393_s19 = smov 10   ;;  %s1394_s20 = smov 60   ;;  %7 = vst.msk [vmem:[%s2779_s1] ss:$48 sm:$0xc0] %vm3_vm4, %v2_v24   ;;  %vm835_vm8 = vcmask 138312  }
   0xb   :  { %s1395_s21 = smov 9   ;;  %s1396_s24 = smov 2   ;;  %975 = vst.msk [vmem:[%s2779_s1 + $0x180] ss:$48 sm:$0x3] %vm3_vm4, %v974_v25   ;;  %vm878_vm9 = vcmask 15360  }
   0xc   :  { %s1397_s27 = smov 1   ;;  %s1398_s28 = smov 53   ;;  %976 = vst.msk [vmem:[%s2779_s1 + $0x180] ss:$48 sm:$0xc] %vm3_vm4, %v974_v25   ;;  %vm887_vm10 = vcmask 138256  }
   0xd   :  { %s1399_s29 = smov 52   ;;  %977 = vst.msk [vmem:[%s2779_s1 + $0x180] ss:$48 sm:$0x30] %vm3_vm4, %v974_v25   ;;  %s1404_s10 = smov 27   ;;  %vm930_vm11 = vcmask 7168  }
   0xe   :  { %112 = vrot.lane.b32.xlu1 %v1457_v6, %s1378_s25  ;;  %99 = vrot.lane.b32.xlu0 %v1462_v7, %s1378_s25  ;;  %978 = vst.msk [vmem:[%s2779_s1 + $0x180] ss:$48 sm:$0xc0] %vm3_vm4, %v974_v25   ;;  %vm939_vm12 = vcmask 138248  }
  0x12   :  { %137 = vrot.lane.b32.xlu1 %v1469_v8, %s1379_s30  ;;  %124 = vrot.lane.b32.xlu0 %v1474_v9, %s1379_s30  ;;  %s1400_s30 = smov 44  }
  0x16   :  { %163 = vrot.lane.b32.xlu1 %v1438_v3, %s1380_s2  ;;  %150 = vrot.lane.b32.xlu0 %v1426_v1, %s1380_s2  ;;  %s1401_s2 = smov 43  }
  0x1a   :  { %189 = vrot.lane.b32.xlu1 %v1433_v2, %s1381_s3  ;;  %176 = vrot.lane.b32.xlu0 %v1421_v0, %s1381_s3  ;;  %s1402_s3 = smov 36  }
  0x1e   :  { %215 = vrot.lane.b32.xlu1 %v1445_v4, %s1382_s4  ;;  %202 = vrot.lane.b32.xlu0 %v1450_v5, %s1382_s4  ;;  %s1403_s4 = smov 35  }
  0x22   :  { %241 = vrot.lane.b32.xlu1 %v1457_v6, %s1383_s5  ;;  %228 = vrot.lane.b32.xlu0 %v1462_v7, %s1383_s5 }
  0x26   :  { %266 = vrot.lane.b32.xlu1 %v1469_v8, %s1384_s6  ;;  %253 = vrot.lane.b32.xlu0 %v1474_v9, %s1384_s6 }
  0x2a   :  { %292 = vrot.lane.b32.xlu1 %v1491_v10, %s1385_s11  ;;  %279 = vrot.lane.b32.xlu0 %v1496_v11, %s1385_s11 }
  0x2e   :  { %318 = vrot.lane.b32.xlu1 %v1433_v2, %s1386_s12  ;;  %305 = vrot.lane.b32.xlu0 %v1421_v0, %s1386_s12 }
  0x32   :  { %344 = vrot.lane.b32.xlu1 %v1445_v4, %s1387_s13  ;;  %331 = vrot.lane.b32.xlu0 %v1450_v5, %s1387_s13 }
  0x36   :  { %370 = vrot.lane.b32.xlu1 %v1457_v6, %s1388_s14  ;;  %357 = vrot.lane.b32.xlu0 %v1462_v7, %s1388_s14  ;;  %s1406_s14 = smov 19  }
  0x3a   :  { %395 = vrot.lane.b32.xlu1 %v1469_v8, %s1389_s15  ;;  %382 = vrot.lane.b32.xlu0 %v1474_v9, %s1389_s15 }
  0x3e   :  { %421 = vrot.lane.b32.xlu1 %v1491_v10, %s1390_s16  ;;  %408 = vrot.lane.b32.xlu0 %v1496_v11, %s1390_s16 }
  0x42   :  { %447 = vrot.lane.b32.xlu1 %v1433_v2, %s1391_s17  ;;  %434 = vrot.lane.b32.xlu0 %v1421_v0, %s1391_s17 }
  0x46   :  { %473 = vrot.lane.b32.xlu1 %v1457_v6, %s1392_s18  ;;  %460 = vrot.lane.b32.xlu0 %v1462_v7, %s1392_s18 }
  0x4a   :  { %773 = vrot.lane.b32.xlu1 %v772_v12, %s1393_s19  ;;  %485 = vrot.lane.b32.xlu0 %v1474_v9, %s1394_s20 }
  0x4e   :  { %824 = vrot.lane.b32.xlu1 %v823_v13, %s1395_s21  ;;  %799 = vrot.lane.b32.xlu0 %v798_v14, %s1393_s19 }
  0x52   :  { %876 = vrot.lane.b32.xlu1 %v875_v15, %s1396_s24  ;;  %850 = vrot.lane.b32.xlu0 %v849_v16, %s1395_s21 }
  0x56   :  { %928 = vrot.lane.b32.xlu1 %v927_v18, %s1397_s27  ;;  %902 = vrot.lane.b32.xlu0 %v901_v19, %s1396_s24 }
  0x5a   :  { %498 = vrot.lane.b32.xlu1 %v1469_v8, %s1394_s20  ;;  %954 = vrot.lane.b32.xlu0 %v953_v21, %s1397_s27  ;;  %s1405_s27 = smov 26  }
  0x5e   :  { %524 = vrot.lane.b32.xlu1 %v1491_v10, %s1398_s28  ;;  %511 = vrot.lane.b32.xlu0 %v1496_v11, %s1398_s28 }
  0x62   :  { %550 = vrot.lane.b32.xlu1 %v1433_v2, %s1399_s29  ;;  %537 = vrot.lane.b32.xlu0 %v1421_v0, %s1399_s29 }
  0x66   :  { %576 = vrot.lane.b32.xlu1 %v1457_v6, %s1400_s30  ;;  %563 = vrot.lane.b32.xlu0 %v1462_v7, %s1400_s30 }
  0x6a   :  { %601 = vrot.lane.b32.xlu1 %v1469_v8, %s1401_s2  ;;  %588 = vrot.lane.b32.xlu0 %v1474_v9, %s1401_s2  ;;  %s1407_s2 = smov 18  }
  0x6e   :  { %627 = vrot.lane.b32.xlu1 %v1491_v10, %s1402_s3  ;;  %614 = vrot.lane.b32.xlu0 %v1496_v11, %s1402_s3 }
  0x72   :  { %653 = vrot.lane.b32.xlu1 %v1433_v2, %s1403_s4  ;;  %640 = vrot.lane.b32.xlu0 %v1421_v0, %s1403_s4 }
  0x74   :  { %v48_v22 = vpop.permute.xlu1 %47   ;;  %v22_v23 = vpop.permute.xlu0 %21  }
  0x75   :  { %990 = vst.msk [vmem:[%s2779_s1 + $0x8] ss:$48 sm:$0x3] %vm3_vm4, %v48_v22   ;;  %991 = vst.msk [vmem:[%s2779_s1 + $0x8] ss:$48 sm:$0xc] %vm3_vm4, %v48_v22  }
  0x76   :  { %992 = vst.msk [vmem:[%s2779_s1 + $0x8] ss:$48 sm:$0x30] %vm3_vm4, %v48_v22   ;;  %993 = vst.msk [vmem:[%s2779_s1 + $0x8] ss:$48 sm:$0xc0] %vm3_vm4, %v48_v22   ;;  %679 = vrot.lane.b32.xlu1 %v1457_v6, %s1404_s10  ;;  %666 = vrot.lane.b32.xlu0 %v1462_v7, %s1404_s10 }
  0x77   :  { %980 = vst.msk [vmem:[%s2779_s1 + $0x4e] ss:$-48 sm:$0x3] %vm3_vm4, %v22_v23   ;;  %981 = vst.msk [vmem:[%s2779_s1 + $0x10e] ss:$-48 sm:$0xc] %vm3_vm4, %v22_v23  }
  0x78   :  { %982 = vst.msk [vmem:[%s2779_s1 + $0x1ce] ss:$-48 sm:$0x30] %vm3_vm4, %v22_v23   ;;  %983 = vst.msk [vmem:[%s2779_s1 + $0x28e] ss:$-48 sm:$0xc0] %vm3_vm4, %v22_v23   ;;  %v61_v26 = vpop.permute.xlu1 %60   ;;  %v35_v27 = vpop.permute.xlu0 %34  }
  0x79   :  { %995 = vst.msk [vmem:[%s2779_s1 + $0x188] ss:$48 sm:$0x3] %vm3_vm4, %v61_v26   ;;  %996 = vst.msk [vmem:[%s2779_s1 + $0x188] ss:$48 sm:$0xc] %vm3_vm4, %v61_v26  }
  0x7a   :  { %997 = vst.msk [vmem:[%s2779_s1 + $0x188] ss:$48 sm:$0x30] %vm3_vm4, %v61_v26   ;;  %998 = vst.msk [vmem:[%s2779_s1 + $0x188] ss:$48 sm:$0xc0] %vm3_vm4, %v61_v26   ;;  %704 = vrot.lane.b32.xlu1 %v1469_v8, %s1405_s27  ;;  %691 = vrot.lane.b32.xlu0 %v1474_v9, %s1405_s27 }
  0x7b   :  { %985 = vst.msk [vmem:[%s2779_s1 + $0x1ce] ss:$-48 sm:$0x3] %vm3_vm4, %v35_v27   ;;  %986 = vst.msk [vmem:[%s2779_s1 + $0x28e] ss:$-48 sm:$0xc] %vm3_vm4, %v35_v27  }
  0x7c   :  { %987 = vst.msk [vmem:[%s2779_s1 + $0x34e] ss:$-48 sm:$0x30] %vm3_vm4, %v35_v27   ;;  %988 = vst.msk [vmem:[%s2779_s1 + $0x40e] ss:$-48 sm:$0xc0] %vm3_vm4, %v35_v27   ;;  %v87_v28 = vpop.permute.xlu1 %86   ;;  %v74_v29 = vpop.permute.xlu0 %73  }
  0x7d   :  { %1005 = vst.msk [vmem:[%s2779_s1 + $0x1a6] ss:$48 sm:$0x3] %vm3_vm4, %v87_v28   ;;  %1006 = vst.msk [vmem:[%s2779_s1 + $0x1a6] ss:$48 sm:$0xc] %vm3_vm4, %v87_v28  }
  0x7e   :  { %1007 = vst.msk [vmem:[%s2779_s1 + $0x1a6] ss:$48 sm:$0x30] %vm3_vm4, %v87_v28   ;;  %1008 = vst.msk [vmem:[%s2779_s1 + $0x1a6] ss:$48 sm:$0xc0] %vm3_vm4, %v87_v28   ;;  %730 = vrot.lane.b32.xlu1 %v1491_v10, %s1406_s14  ;;  %717 = vrot.lane.b32.xlu0 %v1496_v11, %s1406_s14 }
  0x7f   :  { %1000 = vst.msk [vmem:[%s2779_s1 + $0x26] ss:$48 sm:$0x3] %vm3_vm4, %v74_v29   ;;  %1001 = vst.msk [vmem:[%s2779_s1 + $0x26] ss:$48 sm:$0xc] %vm3_vm4, %v74_v29  }
  0x80   :  { %1002 = vst.msk [vmem:[%s2779_s1 + $0x26] ss:$48 sm:$0x30] %vm3_vm4, %v74_v29   ;;  %1003 = vst.msk [vmem:[%s2779_s1 + $0x26] ss:$48 sm:$0xc0] %vm3_vm4, %v74_v29   ;;  %v113_v30 = vpop.permute.xlu1 %112   ;;  %v100_v31 = vpop.permute.xlu0 %99  }
  0x81   :  { %1015 = vst.msk [vmem:[%s2779_s1 + $0x1c0] ss:$-48 sm:$0x3] %vm3_vm4, %v113_v30   ;;  %1016 = vst.msk [vmem:[%s2779_s1 + $0x280] ss:$-48 sm:$0xc] %vm3_vm4, %v113_v30  }
  0x82   :  { %1017 = vst.msk [vmem:[%s2779_s1 + $0x340] ss:$-48 sm:$0x30] %vm3_vm4, %v113_v30   ;;  %1018 = vst.msk [vmem:[%s2779_s1 + $0x400] ss:$-48 sm:$0xc0] %vm3_vm4, %v113_v30   ;;  %756 = vrot.lane.b32.xlu1 %v1433_v2, %s1407_s2  ;;  %743 = vrot.lane.b32.xlu0 %v1421_v0, %s1407_s2 }
  0x83   :  { %1010 = vst.msk [vmem:[%s2779_s1 + $0x40] ss:$-48 sm:$0x3] %vm3_vm4, %v100_v31   ;;  %1011 = vst.msk [vmem:[%s2779_s1 + $0x100] ss:$-48 sm:$0xc] %vm3_vm4, %v100_v31  }
  0x84   :  { %1012 = vst.msk [vmem:[%s2779_s1 + $0x1c0] ss:$-48 sm:$0x30] %vm3_vm4, %v100_v31   ;;  %1013 = vst.msk [vmem:[%s2779_s1 + $0x280] ss:$-48 sm:$0xc0] %vm3_vm4, %v100_v31   ;;  %v138_v32 = vpop.permute.xlu1 %137   ;;  %v125_v33 = vpop.permute.xlu0 %124  }
  0x85   :  { %1024 = vst.msk [vmem:[%s2779_s1 + $0x181] ss:$48 sm:$0x3] %vm3_vm4, %v138_v32   ;;  %1025 = vst.msk [vmem:[%s2779_s1 + $0x181] ss:$48 sm:$0xc] %vm3_vm4, %v138_v32  }
  0x86   :  { %1026 = vst.msk [vmem:[%s2779_s1 + $0x181] ss:$48 sm:$0x30] %vm3_vm4, %v138_v32   ;;  %1027 = vst.msk [vmem:[%s2779_s1 + $0x181] ss:$48 sm:$0xc0] %vm3_vm4, %v138_v32  }
  0x87   :  { %1019 = vst.msk [vmem:[%s2779_s1 + $0x1] ss:$48 sm:$0x3] %vm3_vm4, %v125_v33   ;;  %1020 = vst.msk [vmem:[%s2779_s1 + $0x1] ss:$48 sm:$0xc] %vm3_vm4, %v125_v33  }
  0x88   :  { %1021 = vst.msk [vmem:[%s2779_s1 + $0x1] ss:$48 sm:$0x30] %vm3_vm4, %v125_v33   ;;  %1022 = vst.msk [vmem:[%s2779_s1 + $0x1] ss:$48 sm:$0xc0] %vm3_vm4, %v125_v33   ;;  %v164_v34 = vpop.permute.xlu1 %163   ;;  %v151_v35 = vpop.permute.xlu0 %150  }
  0x89   :  { %1034 = vst.msk [vmem:[%s2779_s1 + $0x1cf] ss:$-48 sm:$0x3] %vm3_vm4, %v164_v34   ;;  %1035 = vst.msk [vmem:[%s2779_s1 + $0x28f] ss:$-48 sm:$0xc] %vm3_vm4, %v164_v34  }
  0x8a   :  { %1036 = vst.msk [vmem:[%s2779_s1 + $0x34f] ss:$-48 sm:$0x30] %vm3_vm4, %v164_v34   ;;  %1037 = vst.msk [vmem:[%s2779_s1 + $0x40f] ss:$-48 sm:$0xc0] %vm3_vm4, %v164_v34  }
  0x8b   :  { %1029 = vst.msk [vmem:[%s2779_s1 + $0x4f] ss:$-48 sm:$0x3] %vm3_vm4, %v151_v35   ;;  %1030 = vst.msk [vmem:[%s2779_s1 + $0x10f] ss:$-48 sm:$0xc] %vm3_vm4, %v151_v35  }
  0x8c   :  { %1031 = vst.msk [vmem:[%s2779_s1 + $0x1cf] ss:$-48 sm:$0x30] %vm3_vm4, %v151_v35   ;;  %1032 = vst.msk [vmem:[%s2779_s1 + $0x28f] ss:$-48 sm:$0xc0] %vm3_vm4, %v151_v35   ;;  %v190_v36 = vpop.permute.xlu1 %189   ;;  %v177_v37 = vpop.permute.xlu0 %176  }
  0x8d   :  { %1044 = vst.msk [vmem:[%s2779_s1 + $0x189] ss:$48 sm:$0x3] %vm3_vm4, %v190_v36   ;;  %1045 = vst.msk [vmem:[%s2779_s1 + $0x189] ss:$48 sm:$0xc] %vm3_vm4, %v190_v36  }
  0x8e   :  { %1046 = vst.msk [vmem:[%s2779_s1 + $0x189] ss:$48 sm:$0x30] %vm3_vm4, %v190_v36   ;;  %1047 = vst.msk [vmem:[%s2779_s1 + $0x189] ss:$48 sm:$0xc0] %vm3_vm4, %v190_v36  }
  0x8f   :  { %1039 = vst.msk [vmem:[%s2779_s1 + $0x9] ss:$48 sm:$0x3] %vm3_vm4, %v177_v37   ;;  %1040 = vst.msk [vmem:[%s2779_s1 + $0x9] ss:$48 sm:$0xc] %vm3_vm4, %v177_v37  }
  0x90   :  { %1041 = vst.msk [vmem:[%s2779_s1 + $0x9] ss:$48 sm:$0x30] %vm3_vm4, %v177_v37   ;;  %1042 = vst.msk [vmem:[%s2779_s1 + $0x9] ss:$48 sm:$0xc0] %vm3_vm4, %v177_v37   ;;  %v216_v38 = vpop.permute.xlu1 %215   ;;  %v203_v39 = vpop.permute.xlu0 %202  }
  0x91   :  { %1054 = vst.msk [vmem:[%s2779_s1 + $0x1a7] ss:$48 sm:$0x3] %vm3_vm4, %v216_v38   ;;  %1055 = vst.msk [vmem:[%s2779_s1 + $0x1a7] ss:$48 sm:$0xc] %vm3_vm4, %v216_v38  }
  0x92   :  { %1056 = vst.msk [vmem:[%s2779_s1 + $0x1a7] ss:$48 sm:$0x30] %vm3_vm4, %v216_v38   ;;  %1057 = vst.msk [vmem:[%s2779_s1 + $0x1a7] ss:$48 sm:$0xc0] %vm3_vm4, %v216_v38  }
  0x93   :  { %1049 = vst.msk [vmem:[%s2779_s1 + $0x27] ss:$48 sm:$0x3] %vm3_vm4, %v203_v39   ;;  %1050 = vst.msk [vmem:[%s2779_s1 + $0x27] ss:$48 sm:$0xc] %vm3_vm4, %v203_v39  }
  0x94   :  { %1051 = vst.msk [vmem:[%s2779_s1 + $0x27] ss:$48 sm:$0x30] %vm3_vm4, %v203_v39   ;;  %1052 = vst.msk [vmem:[%s2779_s1 + $0x27] ss:$48 sm:$0xc0] %vm3_vm4, %v203_v39   ;;  %v242_v40 = vpop.permute.xlu1 %241   ;;  %v229_v41 = vpop.permute.xlu0 %228  }
  0x95   :  { %1064 = vst.msk [vmem:[%s2779_s1 + $0x1c8] ss:$-48 sm:$0x3] %vm3_vm4, %v242_v40   ;;  %1065 = vst.msk [vmem:[%s2779_s1 + $0x288] ss:$-48 sm:$0xc] %vm3_vm4, %v242_v40  }
  0x96   :  { %1066 = vst.msk [vmem:[%s2779_s1 + $0x348] ss:$-48 sm:$0x30] %vm3_vm4, %v242_v40   ;;  %1067 = vst.msk [vmem:[%s2779_s1 + $0x408] ss:$-48 sm:$0xc0] %vm3_vm4, %v242_v40  }
  0x97   :  { %1059 = vst.msk [vmem:[%s2779_s1 + $0x48] ss:$-48 sm:$0x3] %vm3_vm4, %v229_v41   ;;  %1060 = vst.msk [vmem:[%s2779_s1 + $0x108] ss:$-48 sm:$0xc] %vm3_vm4, %v229_v41  }
  0x98   :  { %1061 = vst.msk [vmem:[%s2779_s1 + $0x1c8] ss:$-48 sm:$0x30] %vm3_vm4, %v229_v41   ;;  %1062 = vst.msk [vmem:[%s2779_s1 + $0x288] ss:$-48 sm:$0xc0] %vm3_vm4, %v229_v41   ;;  %v267_v42 = vpop.permute.xlu1 %266   ;;  %v254_v43 = vpop.permute.xlu0 %253  }
  0x99   :  { %1073 = vst.msk [vmem:[%s2779_s1 + $0x182] ss:$48 sm:$0x3] %vm3_vm4, %v267_v42   ;;  %1074 = vst.msk [vmem:[%s2779_s1 + $0x182] ss:$48 sm:$0xc] %vm3_vm4, %v267_v42  }
  0x9a   :  { %1075 = vst.msk [vmem:[%s2779_s1 + $0x182] ss:$48 sm:$0x30] %vm3_vm4, %v267_v42   ;;  %1076 = vst.msk [vmem:[%s2779_s1 + $0x182] ss:$48 sm:$0xc0] %vm3_vm4, %v267_v42  }
  0x9b   :  { %1068 = vst.msk [vmem:[%s2779_s1 + $0x2] ss:$48 sm:$0x3] %vm3_vm4, %v254_v43   ;;  %1069 = vst.msk [vmem:[%s2779_s1 + $0x2] ss:$48 sm:$0xc] %vm3_vm4, %v254_v43  }
  0x9c   :  { %1070 = vst.msk [vmem:[%s2779_s1 + $0x2] ss:$48 sm:$0x30] %vm3_vm4, %v254_v43   ;;  %1071 = vst.msk [vmem:[%s2779_s1 + $0x2] ss:$48 sm:$0xc0] %vm3_vm4, %v254_v43   ;;  %v293_v44 = vpop.permute.xlu1 %292   ;;  %v280_v45 = vpop.permute.xlu0 %279  }
  0x9d   :  { %1083 = vst.msk [vmem:[%s2779_s1 + $0x1a0] ss:$48 sm:$0x3] %vm3_vm4, %v293_v44   ;;  %1084 = vst.msk [vmem:[%s2779_s1 + $0x1a0] ss:$48 sm:$0xc] %vm3_vm4, %v293_v44  }
  0x9e   :  { %1085 = vst.msk [vmem:[%s2779_s1 + $0x1a0] ss:$48 sm:$0x30] %vm3_vm4, %v293_v44   ;;  %1086 = vst.msk [vmem:[%s2779_s1 + $0x1a0] ss:$48 sm:$0xc0] %vm3_vm4, %v293_v44  }
  0x9f   :  { %1078 = vst.msk [vmem:[%s2779_s1 + $0x20] ss:$48 sm:$0x3] %vm3_vm4, %v280_v45   ;;  %1079 = vst.msk [vmem:[%s2779_s1 + $0x20] ss:$48 sm:$0xc] %vm3_vm4, %v280_v45  }
  0xa0   :  { %1080 = vst.msk [vmem:[%s2779_s1 + $0x20] ss:$48 sm:$0x30] %vm3_vm4, %v280_v45   ;;  %1081 = vst.msk [vmem:[%s2779_s1 + $0x20] ss:$48 sm:$0xc0] %vm3_vm4, %v280_v45   ;;  %v319_v46 = vpop.permute.xlu1 %318   ;;  %v306_v47 = vpop.permute.xlu0 %305  }
  0xa1   :  { %1093 = vst.msk [vmem:[%s2779_s1 + $0x18a] ss:$48 sm:$0x3] %vm3_vm4, %v319_v46   ;;  %1094 = vst.msk [vmem:[%s2779_s1 + $0x18a] ss:$48 sm:$0xc] %vm3_vm4, %v319_v46  }
  0xa2   :  { %1095 = vst.msk [vmem:[%s2779_s1 + $0x18a] ss:$48 sm:$0x30] %vm3_vm4, %v319_v46   ;;  %1096 = vst.msk [vmem:[%s2779_s1 + $0x18a] ss:$48 sm:$0xc0] %vm3_vm4, %v319_v46  }
  0xa3   :  { %1088 = vst.msk [vmem:[%s2779_s1 + $0xa] ss:$48 sm:$0x3] %vm3_vm4, %v306_v47   ;;  %1089 = vst.msk [vmem:[%s2779_s1 + $0xa] ss:$48 sm:$0xc] %vm3_vm4, %v306_v47  }
  0xa4   :  { %1090 = vst.msk [vmem:[%s2779_s1 + $0xa] ss:$48 sm:$0x30] %vm3_vm4, %v306_v47   ;;  %1091 = vst.msk [vmem:[%s2779_s1 + $0xa] ss:$48 sm:$0xc0] %vm3_vm4, %v306_v47   ;;  %v345_v48 = vpop.permute.xlu1 %344   ;;  %v332_v49 = vpop.permute.xlu0 %331  }
  0xa5   :  { %1103 = vst.msk [vmem:[%s2779_s1 + $0x1a8] ss:$48 sm:$0x3] %vm3_vm4, %v345_v48   ;;  %1104 = vst.msk [vmem:[%s2779_s1 + $0x1a8] ss:$48 sm:$0xc] %vm3_vm4, %v345_v48  }
  0xa6   :  { %1105 = vst.msk [vmem:[%s2779_s1 + $0x1a8] ss:$48 sm:$0x30] %vm3_vm4, %v345_v48   ;;  %1106 = vst.msk [vmem:[%s2779_s1 + $0x1a8] ss:$48 sm:$0xc0] %vm3_vm4, %v345_v48  }
  0xa7   :  { %1098 = vst.msk [vmem:[%s2779_s1 + $0x28] ss:$48 sm:$0x3] %vm3_vm4, %v332_v49   ;;  %1099 = vst.msk [vmem:[%s2779_s1 + $0x28] ss:$48 sm:$0xc] %vm3_vm4, %v332_v49  }
  0xa8   :  { %1100 = vst.msk [vmem:[%s2779_s1 + $0x28] ss:$48 sm:$0x30] %vm3_vm4, %v332_v49   ;;  %1101 = vst.msk [vmem:[%s2779_s1 + $0x28] ss:$48 sm:$0xc0] %vm3_vm4, %v332_v49   ;;  %v371_v50 = vpop.permute.xlu1 %370   ;;  %v358_v51 = vpop.permute.xlu0 %357  }
  0xa9   :  { %1113 = vst.msk [vmem:[%s2779_s1 + $0x1c9] ss:$-48 sm:$0x3] %vm3_vm4, %v371_v50   ;;  %1114 = vst.msk [vmem:[%s2779_s1 + $0x289] ss:$-48 sm:$0xc] %vm3_vm4, %v371_v50  }
  0xaa   :  { %1115 = vst.msk [vmem:[%s2779_s1 + $0x349] ss:$-48 sm:$0x30] %vm3_vm4, %v371_v50   ;;  %1116 = vst.msk [vmem:[%s2779_s1 + $0x409] ss:$-48 sm:$0xc0] %vm3_vm4, %v371_v50  }
  0xab   :  { %1108 = vst.msk [vmem:[%s2779_s1 + $0x49] ss:$-48 sm:$0x3] %vm3_vm4, %v358_v51   ;;  %1109 = vst.msk [vmem:[%s2779_s1 + $0x109] ss:$-48 sm:$0xc] %vm3_vm4, %v358_v51  }
  0xac   :  { %1110 = vst.msk [vmem:[%s2779_s1 + $0x1c9] ss:$-48 sm:$0x30] %vm3_vm4, %v358_v51   ;;  %1111 = vst.msk [vmem:[%s2779_s1 + $0x289] ss:$-48 sm:$0xc0] %vm3_vm4, %v358_v51   ;;  %v396_v52 = vpop.permute.xlu1 %395   ;;  %v383_v53 = vpop.permute.xlu0 %382  }
  0xad   :  { %1122 = vst.msk [vmem:[%s2779_s1 + $0x183] ss:$48 sm:$0x3] %vm3_vm4, %v396_v52   ;;  %1123 = vst.msk [vmem:[%s2779_s1 + $0x183] ss:$48 sm:$0xc] %vm3_vm4, %v396_v52  }
  0xae   :  { %1124 = vst.msk [vmem:[%s2779_s1 + $0x183] ss:$48 sm:$0x30] %vm3_vm4, %v396_v52   ;;  %1125 = vst.msk [vmem:[%s2779_s1 + $0x183] ss:$48 sm:$0xc0] %vm3_vm4, %v396_v52  }
  0xaf   :  { %1117 = vst.msk [vmem:[%s2779_s1 + $0x3] ss:$48 sm:$0x3] %vm3_vm4, %v383_v53   ;;  %1118 = vst.msk [vmem:[%s2779_s1 + $0x3] ss:$48 sm:$0xc] %vm3_vm4, %v383_v53  }
  0xb0   :  { %1119 = vst.msk [vmem:[%s2779_s1 + $0x3] ss:$48 sm:$0x30] %vm3_vm4, %v383_v53   ;;  %1120 = vst.msk [vmem:[%s2779_s1 + $0x3] ss:$48 sm:$0xc0] %vm3_vm4, %v383_v53   ;;  %v422_v54 = vpop.permute.xlu1 %421   ;;  %v409_v55 = vpop.permute.xlu0 %408  }
  0xb1   :  { %1132 = vst.msk [vmem:[%s2779_s1 + $0x1a1] ss:$48 sm:$0x3] %vm3_vm4, %v422_v54   ;;  %1133 = vst.msk [vmem:[%s2779_s1 + $0x1a1] ss:$48 sm:$0xc] %vm3_vm4, %v422_v54  }
  0xb2   :  { %1134 = vst.msk [vmem:[%s2779_s1 + $0x1a1] ss:$48 sm:$0x30] %vm3_vm4, %v422_v54   ;;  %1135 = vst.msk [vmem:[%s2779_s1 + $0x1a1] ss:$48 sm:$0xc0] %vm3_vm4, %v422_v54  }
  0xb3   :  { %1127 = vst.msk [vmem:[%s2779_s1 + $0x21] ss:$48 sm:$0x3] %vm3_vm4, %v409_v55   ;;  %1128 = vst.msk [vmem:[%s2779_s1 + $0x21] ss:$48 sm:$0xc] %vm3_vm4, %v409_v55  }
  0xb4   :  { %1129 = vst.msk [vmem:[%s2779_s1 + $0x21] ss:$48 sm:$0x30] %vm3_vm4, %v409_v55   ;;  %1130 = vst.msk [vmem:[%s2779_s1 + $0x21] ss:$48 sm:$0xc0] %vm3_vm4, %v409_v55   ;;  %v448_v56 = vpop.permute.xlu1 %447   ;;  %v435_v57 = vpop.permute.xlu0 %434  }
  0xb5   :  { %1142 = vst.msk [vmem:[%s2779_s1 + $0x18b] ss:$48 sm:$0x3] %vm3_vm4, %v448_v56   ;;  %1143 = vst.msk [vmem:[%s2779_s1 + $0x18b] ss:$48 sm:$0xc] %vm3_vm4, %v448_v56  }
  0xb6   :  { %1144 = vst.msk [vmem:[%s2779_s1 + $0x18b] ss:$48 sm:$0x30] %vm3_vm4, %v448_v56   ;;  %1145 = vst.msk [vmem:[%s2779_s1 + $0x18b] ss:$48 sm:$0xc0] %vm3_vm4, %v448_v56  }
  0xb7   :  { %1137 = vst.msk [vmem:[%s2779_s1 + $0xb] ss:$48 sm:$0x3] %vm3_vm4, %v435_v57   ;;  %1138 = vst.msk [vmem:[%s2779_s1 + $0xb] ss:$48 sm:$0xc] %vm3_vm4, %v435_v57  }
  0xb8   :  { %1139 = vst.msk [vmem:[%s2779_s1 + $0xb] ss:$48 sm:$0x30] %vm3_vm4, %v435_v57   ;;  %1140 = vst.msk [vmem:[%s2779_s1 + $0xb] ss:$48 sm:$0xc0] %vm3_vm4, %v435_v57   ;;  %v474_v58 = vpop.permute.xlu1 %473   ;;  %v461_v59 = vpop.permute.xlu0 %460  }
  0xb9   :  { %1152 = vst.msk [vmem:[%s2779_s1 + $0x1ca] ss:$-48 sm:$0x3] %vm3_vm4, %v474_v58   ;;  %1153 = vst.msk [vmem:[%s2779_s1 + $0x28a] ss:$-48 sm:$0xc] %vm3_vm4, %v474_v58  }
  0xba   :  { %1154 = vst.msk [vmem:[%s2779_s1 + $0x34a] ss:$-48 sm:$0x30] %vm3_vm4, %v474_v58   ;;  %1155 = vst.msk [vmem:[%s2779_s1 + $0x40a] ss:$-48 sm:$0xc0] %vm3_vm4, %v474_v58  }
  0xbb   :  { %1147 = vst.msk [vmem:[%s2779_s1 + $0x4a] ss:$-48 sm:$0x3] %vm3_vm4, %v461_v59   ;;  %1148 = vst.msk [vmem:[%s2779_s1 + $0x10a] ss:$-48 sm:$0xc] %vm3_vm4, %v461_v59  }
  0xbc   :  { %1149 = vst.msk [vmem:[%s2779_s1 + $0x1ca] ss:$-48 sm:$0x30] %vm3_vm4, %v461_v59   ;;  %1150 = vst.msk [vmem:[%s2779_s1 + $0x28a] ss:$-48 sm:$0xc0] %vm3_vm4, %v461_v59   ;;  %v774_v60 = vpop.permute.xlu1 %773   ;;  %v486_v61 = vpop.permute.xlu0 %485  }
  0xbd   :  { %1265 = vst.msk [vmem:[%s2779_s1 + $0x4d] ss:$-48 sm:$0x3] %vm775_vm5, %v774_v60   ;;  %1266 = vst.msk [vmem:[%s2779_s1 + $0x10d] ss:$-48 sm:$0xc] %vm775_vm5, %v774_v60  }
  0xbe   :  { %1267 = vst.msk [vmem:[%s2779_s1 + $0x1cd] ss:$-48 sm:$0x30] %vm775_vm5, %v774_v60   ;;  %1268 = vst.msk [vmem:[%s2779_s1 + $0x28d] ss:$-48 sm:$0xc0] %vm775_vm5, %v774_v60  }
  0xbf   :  { %1156 = vst.msk [vmem:[%s2779_s1 + $0x4] ss:$48 sm:$0x3] %vm3_vm4, %v486_v61   ;;  %1157 = vst.msk [vmem:[%s2779_s1 + $0x4] ss:$48 sm:$0xc] %vm3_vm4, %v486_v61  }
  0xc0   :  { %1158 = vst.msk [vmem:[%s2779_s1 + $0x4] ss:$48 sm:$0x30] %vm3_vm4, %v486_v61   ;;  %1159 = vst.msk [vmem:[%s2779_s1 + $0x4] ss:$48 sm:$0xc0] %vm3_vm4, %v486_v61   ;;  %v825_v62 = vpop.permute.xlu1 %824   ;;  %v800_v63 = vpop.permute.xlu0 %799  }
  0xc1   :  { %1269 = vst.msk [vmem:[%s2779_s1 + $0x4d] ss:$-48 sm:$0x3] %vm784_vm6, %v774_v60   ;;  %1270 = vst.msk [vmem:[%s2779_s1 + $0x10d] ss:$-48 sm:$0xc] %vm784_vm6, %v774_v60  }
  0xc2   :  { %1271 = vst.msk [vmem:[%s2779_s1 + $0x1cd] ss:$-48 sm:$0x30] %vm784_vm6, %v774_v60   ;;  %1272 = vst.msk [vmem:[%s2779_s1 + $0x28d] ss:$-48 sm:$0xc0] %vm784_vm6, %v774_v60  }
  0xc3   :  { %1284 = vst.msk [vmem:[%s2779_s1 + $0x7] ss:$48 sm:$0x3] %vm826_vm7, %v825_v62   ;;  %1285 = vst.msk [vmem:[%s2779_s1 + $0x7] ss:$48 sm:$0xc] %vm826_vm7, %v825_v62  }
  0xc4   :  { %1286 = vst.msk [vmem:[%s2779_s1 + $0x7] ss:$48 sm:$0x30] %vm826_vm7, %v825_v62   ;;  %1287 = vst.msk [vmem:[%s2779_s1 + $0x7] ss:$48 sm:$0xc0] %vm826_vm7, %v825_v62   ;;  %v877_v0 = vpop.permute.xlu1 %876   ;;  %v851_v1 = vpop.permute.xlu0 %850  }
  0xc5   :  { %1275 = vst.msk [vmem:[%s2779_s1 + $0x1cd] ss:$-48 sm:$0x3] %vm775_vm5, %v800_v63   ;;  %1276 = vst.msk [vmem:[%s2779_s1 + $0x28d] ss:$-48 sm:$0xc] %vm775_vm5, %v800_v63  }
  0xc6   :  { %1277 = vst.msk [vmem:[%s2779_s1 + $0x34d] ss:$-48 sm:$0x30] %vm775_vm5, %v800_v63   ;;  %1278 = vst.msk [vmem:[%s2779_s1 + $0x40d] ss:$-48 sm:$0xc0] %vm775_vm5, %v800_v63  }
  0xc7   :  { %1288 = vst.msk [vmem:[%s2779_s1 + $0x7] ss:$48 sm:$0x3] %vm835_vm8, %v825_v62   ;;  %1289 = vst.msk [vmem:[%s2779_s1 + $0x7] ss:$48 sm:$0xc] %vm835_vm8, %v825_v62  }
  0xc8   :  { %1290 = vst.msk [vmem:[%s2779_s1 + $0x7] ss:$48 sm:$0x30] %vm835_vm8, %v825_v62   ;;  %1291 = vst.msk [vmem:[%s2779_s1 + $0x7] ss:$48 sm:$0xc0] %vm835_vm8, %v825_v62   ;;  %v929_v2 = vpop.permute.xlu1 %928   ;;  %v903_v3 = vpop.permute.xlu0 %902  }
  0xc9   :  { %1279 = vst.msk [vmem:[%s2779_s1 + $0x1cd] ss:$-48 sm:$0x3] %vm784_vm6, %v800_v63   ;;  %1280 = vst.msk [vmem:[%s2779_s1 + $0x28d] ss:$-48 sm:$0xc] %vm784_vm6, %v800_v63  }
  0xca   :  { %1281 = vst.msk [vmem:[%s2779_s1 + $0x34d] ss:$-48 sm:$0x30] %vm784_vm6, %v800_v63   ;;  %1282 = vst.msk [vmem:[%s2779_s1 + $0x40d] ss:$-48 sm:$0xc0] %vm784_vm6, %v800_v63  }
  0xcb   :  { %1304 = vst.msk [vmem:[%s2779_s1 + $0x25] ss:$48 sm:$0x3] %vm878_vm9, %v877_v0   ;;  %1305 = vst.msk [vmem:[%s2779_s1 + $0x25] ss:$48 sm:$0xc] %vm878_vm9, %v877_v0  }
  0xcc   :  { %1306 = vst.msk [vmem:[%s2779_s1 + $0x25] ss:$48 sm:$0x30] %vm878_vm9, %v877_v0   ;;  %1307 = vst.msk [vmem:[%s2779_s1 + $0x25] ss:$48 sm:$0xc0] %vm878_vm9, %v877_v0   ;;  %v499_v4 = vpop.permute.xlu1 %498   ;;  %v955_v5 = vpop.permute.xlu0 %954  }
  0xcd   :  { %1294 = vst.msk [vmem:[%s2779_s1 + $0x187] ss:$48 sm:$0x3] %vm826_vm7, %v851_v1   ;;  %1295 = vst.msk [vmem:[%s2779_s1 + $0x187] ss:$48 sm:$0xc] %vm826_vm7, %v851_v1  }
  0xce   :  { %1296 = vst.msk [vmem:[%s2779_s1 + $0x187] ss:$48 sm:$0x30] %vm826_vm7, %v851_v1   ;;  %1297 = vst.msk [vmem:[%s2779_s1 + $0x187] ss:$48 sm:$0xc0] %vm826_vm7, %v851_v1  }
  0xcf   :  { %1308 = vst.msk [vmem:[%s2779_s1 + $0x25] ss:$48 sm:$0x3] %vm887_vm10, %v877_v0   ;;  %1309 = vst.msk [vmem:[%s2779_s1 + $0x25] ss:$48 sm:$0xc] %vm887_vm10, %v877_v0  }
  0xd0   :  { %1310 = vst.msk [vmem:[%s2779_s1 + $0x25] ss:$48 sm:$0x30] %vm887_vm10, %v877_v0   ;;  %1311 = vst.msk [vmem:[%s2779_s1 + $0x25] ss:$48 sm:$0xc0] %vm887_vm10, %v877_v0   ;;  %v525_v6 = vpop.permute.xlu1 %524   ;;  %v512_v7 = vpop.permute.xlu0 %511  }
  0xd1   :  { %1298 = vst.msk [vmem:[%s2779_s1 + $0x187] ss:$48 sm:$0x3] %vm835_vm8, %v851_v1   ;;  %1299 = vst.msk [vmem:[%s2779_s1 + $0x187] ss:$48 sm:$0xc] %vm835_vm8, %v851_v1  }
  0xd2   :  { %1300 = vst.msk [vmem:[%s2779_s1 + $0x187] ss:$48 sm:$0x30] %vm835_vm8, %v851_v1   ;;  %1301 = vst.msk [vmem:[%s2779_s1 + $0x187] ss:$48 sm:$0xc0] %vm835_vm8, %v851_v1  }
  0xd3   :  { %1324 = vst.msk [vmem:[%s2779_s1 + $0xf] ss:$48 sm:$0x3] %vm930_vm11, %v929_v2   ;;  %1325 = vst.msk [vmem:[%s2779_s1 + $0xf] ss:$48 sm:$0xc] %vm930_vm11, %v929_v2  }
  0xd4   :  { %1326 = vst.msk [vmem:[%s2779_s1 + $0xf] ss:$48 sm:$0x30] %vm930_vm11, %v929_v2   ;;  %1327 = vst.msk [vmem:[%s2779_s1 + $0xf] ss:$48 sm:$0xc0] %vm930_vm11, %v929_v2   ;;  %v551_v8 = vpop.permute.xlu1 %550   ;;  %v538_v9 = vpop.permute.xlu0 %537  }
  0xd5   :  { %1314 = vst.msk [vmem:[%s2779_s1 + $0x1a5] ss:$48 sm:$0x3] %vm878_vm9, %v903_v3   ;;  %1315 = vst.msk [vmem:[%s2779_s1 + $0x1a5] ss:$48 sm:$0xc] %vm878_vm9, %v903_v3  }
  0xd6   :  { %1316 = vst.msk [vmem:[%s2779_s1 + $0x1a5] ss:$48 sm:$0x30] %vm878_vm9, %v903_v3   ;;  %1317 = vst.msk [vmem:[%s2779_s1 + $0x1a5] ss:$48 sm:$0xc0] %vm878_vm9, %v903_v3  }
  0xd7   :  { %1328 = vst.msk [vmem:[%s2779_s1 + $0xf] ss:$48 sm:$0x3] %vm939_vm12, %v929_v2   ;;  %1329 = vst.msk [vmem:[%s2779_s1 + $0xf] ss:$48 sm:$0xc] %vm939_vm12, %v929_v2  }
  0xd8   :  { %1330 = vst.msk [vmem:[%s2779_s1 + $0xf] ss:$48 sm:$0x30] %vm939_vm12, %v929_v2   ;;  %1331 = vst.msk [vmem:[%s2779_s1 + $0xf] ss:$48 sm:$0xc0] %vm939_vm12, %v929_v2   ;;  %v577_v10 = vpop.permute.xlu1 %576   ;;  %v564_v11 = vpop.permute.xlu0 %563  }
  0xd9   :  { %1318 = vst.msk [vmem:[%s2779_s1 + $0x1a5] ss:$48 sm:$0x3] %vm887_vm10, %v903_v3   ;;  %1319 = vst.msk [vmem:[%s2779_s1 + $0x1a5] ss:$48 sm:$0xc] %vm887_vm10, %v903_v3  }
  0xda   :  { %1320 = vst.msk [vmem:[%s2779_s1 + $0x1a5] ss:$48 sm:$0x30] %vm887_vm10, %v903_v3   ;;  %1321 = vst.msk [vmem:[%s2779_s1 + $0x1a5] ss:$48 sm:$0xc0] %vm887_vm10, %v903_v3  }
  0xdb   :  { %1161 = vst.msk [vmem:[%s2779_s1 + $0x184] ss:$48 sm:$0x3] %vm3_vm4, %v499_v4   ;;  %1162 = vst.msk [vmem:[%s2779_s1 + $0x184] ss:$48 sm:$0xc] %vm3_vm4, %v499_v4  }
  0xdc   :  { %1163 = vst.msk [vmem:[%s2779_s1 + $0x184] ss:$48 sm:$0x30] %vm3_vm4, %v499_v4   ;;  %1164 = vst.msk [vmem:[%s2779_s1 + $0x184] ss:$48 sm:$0xc0] %vm3_vm4, %v499_v4   ;;  %v602_v12 = vpop.permute.xlu1 %601   ;;  %v589_v13 = vpop.permute.xlu0 %588  }
  0xdd   :  { %1334 = vst.msk [vmem:[%s2779_s1 + $0x18f] ss:$48 sm:$0x3] %vm930_vm11, %v955_v5   ;;  %1335 = vst.msk [vmem:[%s2779_s1 + $0x18f] ss:$48 sm:$0xc] %vm930_vm11, %v955_v5  }
  0xde   :  { %1336 = vst.msk [vmem:[%s2779_s1 + $0x18f] ss:$48 sm:$0x30] %vm930_vm11, %v955_v5   ;;  %1337 = vst.msk [vmem:[%s2779_s1 + $0x18f] ss:$48 sm:$0xc0] %vm930_vm11, %v955_v5  }
  0xdf   :  { %1338 = vst.msk [vmem:[%s2779_s1 + $0x18f] ss:$48 sm:$0x3] %vm939_vm12, %v955_v5   ;;  %1339 = vst.msk [vmem:[%s2779_s1 + $0x18f] ss:$48 sm:$0xc] %vm939_vm12, %v955_v5  }
  0xe0   :  { %1340 = vst.msk [vmem:[%s2779_s1 + $0x18f] ss:$48 sm:$0x30] %vm939_vm12, %v955_v5   ;;  %1341 = vst.msk [vmem:[%s2779_s1 + $0x18f] ss:$48 sm:$0xc0] %vm939_vm12, %v955_v5   ;;  %v628_v14 = vpop.permute.xlu1 %627   ;;  %v615_v15 = vpop.permute.xlu0 %614  }
  0xe1   :  { %1171 = vst.msk [vmem:[%s2779_s1 + $0x1a2] ss:$48 sm:$0x3] %vm3_vm4, %v525_v6   ;;  %1172 = vst.msk [vmem:[%s2779_s1 + $0x1a2] ss:$48 sm:$0xc] %vm3_vm4, %v525_v6  }
  0xe2   :  { %1173 = vst.msk [vmem:[%s2779_s1 + $0x1a2] ss:$48 sm:$0x30] %vm3_vm4, %v525_v6   ;;  %1174 = vst.msk [vmem:[%s2779_s1 + $0x1a2] ss:$48 sm:$0xc0] %vm3_vm4, %v525_v6  }
  0xe3   :  { %1166 = vst.msk [vmem:[%s2779_s1 + $0x22] ss:$48 sm:$0x3] %vm3_vm4, %v512_v7   ;;  %1167 = vst.msk [vmem:[%s2779_s1 + $0x22] ss:$48 sm:$0xc] %vm3_vm4, %v512_v7  }
  0xe4   :  { %1168 = vst.msk [vmem:[%s2779_s1 + $0x22] ss:$48 sm:$0x30] %vm3_vm4, %v512_v7   ;;  %1169 = vst.msk [vmem:[%s2779_s1 + $0x22] ss:$48 sm:$0xc0] %vm3_vm4, %v512_v7   ;;  %v654_v16 = vpop.permute.xlu1 %653   ;;  %v641_v17 = vpop.permute.xlu0 %640  }
  0xe5   :  { %1181 = vst.msk [vmem:[%s2779_s1 + $0x18c] ss:$48 sm:$0x3] %vm3_vm4, %v551_v8   ;;  %1182 = vst.msk [vmem:[%s2779_s1 + $0x18c] ss:$48 sm:$0xc] %vm3_vm4, %v551_v8  }
  0xe6   :  { %1183 = vst.msk [vmem:[%s2779_s1 + $0x18c] ss:$48 sm:$0x30] %vm3_vm4, %v551_v8   ;;  %1184 = vst.msk [vmem:[%s2779_s1 + $0x18c] ss:$48 sm:$0xc0] %vm3_vm4, %v551_v8  }
  0xe7   :  { %1176 = vst.msk [vmem:[%s2779_s1 + $0xc] ss:$48 sm:$0x3] %vm3_vm4, %v538_v9   ;;  %1177 = vst.msk [vmem:[%s2779_s1 + $0xc] ss:$48 sm:$0xc] %vm3_vm4, %v538_v9  }
  0xe8   :  { %1178 = vst.msk [vmem:[%s2779_s1 + $0xc] ss:$48 sm:$0x30] %vm3_vm4, %v538_v9   ;;  %1179 = vst.msk [vmem:[%s2779_s1 + $0xc] ss:$48 sm:$0xc0] %vm3_vm4, %v538_v9   ;;  %v680_v18 = vpop.permute.xlu1 %679   ;;  %v667_v19 = vpop.permute.xlu0 %666  }
  0xe9   :  { %1191 = vst.msk [vmem:[%s2779_s1 + $0x1cb] ss:$-48 sm:$0x3] %vm3_vm4, %v577_v10   ;;  %1192 = vst.msk [vmem:[%s2779_s1 + $0x28b] ss:$-48 sm:$0xc] %vm3_vm4, %v577_v10  }
  0xea   :  { %1193 = vst.msk [vmem:[%s2779_s1 + $0x34b] ss:$-48 sm:$0x30] %vm3_vm4, %v577_v10   ;;  %1194 = vst.msk [vmem:[%s2779_s1 + $0x40b] ss:$-48 sm:$0xc0] %vm3_vm4, %v577_v10  }
  0xeb   :  { %1186 = vst.msk [vmem:[%s2779_s1 + $0x4b] ss:$-48 sm:$0x3] %vm3_vm4, %v564_v11   ;;  %1187 = vst.msk [vmem:[%s2779_s1 + $0x10b] ss:$-48 sm:$0xc] %vm3_vm4, %v564_v11  }
  0xec   :  { %1188 = vst.msk [vmem:[%s2779_s1 + $0x1cb] ss:$-48 sm:$0x30] %vm3_vm4, %v564_v11   ;;  %1189 = vst.msk [vmem:[%s2779_s1 + $0x28b] ss:$-48 sm:$0xc0] %vm3_vm4, %v564_v11   ;;  %v705_v20 = vpop.permute.xlu1 %704   ;;  %v692_v21 = vpop.permute.xlu0 %691  }
  0xed   :  { %1200 = vst.msk [vmem:[%s2779_s1 + $0x185] ss:$48 sm:$0x3] %vm3_vm4, %v602_v12   ;;  %1201 = vst.msk [vmem:[%s2779_s1 + $0x185] ss:$48 sm:$0xc] %vm3_vm4, %v602_v12  }
  0xee   :  { %1202 = vst.msk [vmem:[%s2779_s1 + $0x185] ss:$48 sm:$0x30] %vm3_vm4, %v602_v12   ;;  %1203 = vst.msk [vmem:[%s2779_s1 + $0x185] ss:$48 sm:$0xc0] %vm3_vm4, %v602_v12  }
  0xef   :  { %1195 = vst.msk [vmem:[%s2779_s1 + $0x5] ss:$48 sm:$0x3] %vm3_vm4, %v589_v13   ;;  %1196 = vst.msk [vmem:[%s2779_s1 + $0x5] ss:$48 sm:$0xc] %vm3_vm4, %v589_v13  }
  0xf0   :  { %1197 = vst.msk [vmem:[%s2779_s1 + $0x5] ss:$48 sm:$0x30] %vm3_vm4, %v589_v13   ;;  %1198 = vst.msk [vmem:[%s2779_s1 + $0x5] ss:$48 sm:$0xc0] %vm3_vm4, %v589_v13   ;;  %v731_v22 = vpop.permute.xlu1 %730   ;;  %v718_v23 = vpop.permute.xlu0 %717  }
  0xf1   :  { %1210 = vst.msk [vmem:[%s2779_s1 + $0x1a3] ss:$48 sm:$0x3] %vm3_vm4, %v628_v14   ;;  %1211 = vst.msk [vmem:[%s2779_s1 + $0x1a3] ss:$48 sm:$0xc] %vm3_vm4, %v628_v14  }
  0xf2   :  { %1212 = vst.msk [vmem:[%s2779_s1 + $0x1a3] ss:$48 sm:$0x30] %vm3_vm4, %v628_v14   ;;  %1213 = vst.msk [vmem:[%s2779_s1 + $0x1a3] ss:$48 sm:$0xc0] %vm3_vm4, %v628_v14  }
  0xf3   :  { %1205 = vst.msk [vmem:[%s2779_s1 + $0x23] ss:$48 sm:$0x3] %vm3_vm4, %v615_v15   ;;  %1206 = vst.msk [vmem:[%s2779_s1 + $0x23] ss:$48 sm:$0xc] %vm3_vm4, %v615_v15  }
  0xf4   :  { %1207 = vst.msk [vmem:[%s2779_s1 + $0x23] ss:$48 sm:$0x30] %vm3_vm4, %v615_v15   ;;  %1208 = vst.msk [vmem:[%s2779_s1 + $0x23] ss:$48 sm:$0xc0] %vm3_vm4, %v615_v15   ;;  %v757_v24 = vpop.permute.xlu1 %756   ;;  %v744_v25 = vpop.permute.xlu0 %743  }
  0xf5   :  { %1220 = vst.msk [vmem:[%s2779_s1 + $0x18d] ss:$48 sm:$0x3] %vm3_vm4, %v654_v16   ;;  %1221 = vst.msk [vmem:[%s2779_s1 + $0x18d] ss:$48 sm:$0xc] %vm3_vm4, %v654_v16  }
  0xf6   :  { %1222 = vst.msk [vmem:[%s2779_s1 + $0x18d] ss:$48 sm:$0x30] %vm3_vm4, %v654_v16   ;;  %1223 = vst.msk [vmem:[%s2779_s1 + $0x18d] ss:$48 sm:$0xc0] %vm3_vm4, %v654_v16  }
  0xf7   :  { %1215 = vst.msk [vmem:[%s2779_s1 + $0xd] ss:$48 sm:$0x3] %vm3_vm4, %v641_v17   ;;  %1216 = vst.msk [vmem:[%s2779_s1 + $0xd] ss:$48 sm:$0xc] %vm3_vm4, %v641_v17  }
  0xf8   :  { %1217 = vst.msk [vmem:[%s2779_s1 + $0xd] ss:$48 sm:$0x30] %vm3_vm4, %v641_v17   ;;  %1218 = vst.msk [vmem:[%s2779_s1 + $0xd] ss:$48 sm:$0xc0] %vm3_vm4, %v641_v17  }
  0xf9   :  { %1230 = vst.msk [vmem:[%s2779_s1 + $0x1cc] ss:$-48 sm:$0x3] %vm3_vm4, %v680_v18   ;;  %1231 = vst.msk [vmem:[%s2779_s1 + $0x28c] ss:$-48 sm:$0xc] %vm3_vm4, %v680_v18  }
  0xfa   :  { %1232 = vst.msk [vmem:[%s2779_s1 + $0x34c] ss:$-48 sm:$0x30] %vm3_vm4, %v680_v18   ;;  %1233 = vst.msk [vmem:[%s2779_s1 + $0x40c] ss:$-48 sm:$0xc0] %vm3_vm4, %v680_v18  }
  0xfb   :  { %1225 = vst.msk [vmem:[%s2779_s1 + $0x4c] ss:$-48 sm:$0x3] %vm3_vm4, %v667_v19   ;;  %1226 = vst.msk [vmem:[%s2779_s1 + $0x10c] ss:$-48 sm:$0xc] %vm3_vm4, %v667_v19  }
  0xfc   :  { %1227 = vst.msk [vmem:[%s2779_s1 + $0x1cc] ss:$-48 sm:$0x30] %vm3_vm4, %v667_v19   ;;  %1228 = vst.msk [vmem:[%s2779_s1 + $0x28c] ss:$-48 sm:$0xc0] %vm3_vm4, %v667_v19  }
  0xfd   :  { %1239 = vst.msk [vmem:[%s2779_s1 + $0x186] ss:$48 sm:$0x3] %vm3_vm4, %v705_v20   ;;  %1240 = vst.msk [vmem:[%s2779_s1 + $0x186] ss:$48 sm:$0xc] %vm3_vm4, %v705_v20  }
  0xfe   :  { %1241 = vst.msk [vmem:[%s2779_s1 + $0x186] ss:$48 sm:$0x30] %vm3_vm4, %v705_v20   ;;  %1242 = vst.msk [vmem:[%s2779_s1 + $0x186] ss:$48 sm:$0xc0] %vm3_vm4, %v705_v20  }
  0xff   :  { %1234 = vst.msk [vmem:[%s2779_s1 + $0x6] ss:$48 sm:$0x3] %vm3_vm4, %v692_v21   ;;  %1235 = vst.msk [vmem:[%s2779_s1 + $0x6] ss:$48 sm:$0xc] %vm3_vm4, %v692_v21  }
 0x100   :  { %1236 = vst.msk [vmem:[%s2779_s1 + $0x6] ss:$48 sm:$0x30] %vm3_vm4, %v692_v21   ;;  %1237 = vst.msk [vmem:[%s2779_s1 + $0x6] ss:$48 sm:$0xc0] %vm3_vm4, %v692_v21  }
 0x101   :  { %1249 = vst.msk [vmem:[%s2779_s1 + $0x1a4] ss:$48 sm:$0x3] %vm3_vm4, %v731_v22   ;;  %1250 = vst.msk [vmem:[%s2779_s1 + $0x1a4] ss:$48 sm:$0xc] %vm3_vm4, %v731_v22  }
 0x102   :  { %1251 = vst.msk [vmem:[%s2779_s1 + $0x1a4] ss:$48 sm:$0x30] %vm3_vm4, %v731_v22   ;;  %1252 = vst.msk [vmem:[%s2779_s1 + $0x1a4] ss:$48 sm:$0xc0] %vm3_vm4, %v731_v22  }
 0x103   :  { %1244 = vst.msk [vmem:[%s2779_s1 + $0x24] ss:$48 sm:$0x3] %vm3_vm4, %v718_v23   ;;  %1245 = vst.msk [vmem:[%s2779_s1 + $0x24] ss:$48 sm:$0xc] %vm3_vm4, %v718_v23  }
 0x104   :  { %1246 = vst.msk [vmem:[%s2779_s1 + $0x24] ss:$48 sm:$0x30] %vm3_vm4, %v718_v23   ;;  %1247 = vst.msk [vmem:[%s2779_s1 + $0x24] ss:$48 sm:$0xc0] %vm3_vm4, %v718_v23  }
 0x105   :  { %1259 = vst.msk [vmem:[%s2779_s1 + $0x18e] ss:$48 sm:$0x3] %vm3_vm4, %v757_v24   ;;  %1260 = vst.msk [vmem:[%s2779_s1 + $0x18e] ss:$48 sm:$0xc] %vm3_vm4, %v757_v24  }
 0x106   :  { %1261 = vst.msk [vmem:[%s2779_s1 + $0x18e] ss:$48 sm:$0x30] %vm3_vm4, %v757_v24   ;;  %1262 = vst.msk [vmem:[%s2779_s1 + $0x18e] ss:$48 sm:$0xc0] %vm3_vm4, %v757_v24  }
 0x107   :  { %1254 = vst.msk [vmem:[%s2779_s1 + $0xe] ss:$48 sm:$0x3] %vm3_vm4, %v744_v25   ;;  %1255 = vst.msk [vmem:[%s2779_s1 + $0xe] ss:$48 sm:$0xc] %vm3_vm4, %v744_v25  }
 0x108   :  { %1256 = vst.msk [vmem:[%s2779_s1 + $0xe] ss:$48 sm:$0x30] %vm3_vm4, %v744_v25   ;;  %1257 = vst.msk [vmem:[%s2779_s1 + $0xe] ss:$48 sm:$0xc0] %vm3_vm4, %v744_v25  }

</bundles_post_ra>
